<compile_context>
chip_gen: v7x
topology: tpu7x:2x2x1
jax: 0.10.0
libtpu: 0.0.40
codegen_flags: <defaults>
</compile_context>

<pallas_src>
import functools
import math

import jax
import jax.numpy as jnp
from jax.experimental import pallas as pl
from jax.experimental.pallas import tpu as pltpu

BN_EPS = 1e-5


def _round_up(n, m):
    return ((n + m - 1) // m) * m


def _pad2d(a, rows, cols):
    r, c = a.shape
    return jnp.pad(a, ((0, rows - r), (0, cols - c)))


def _bn_relu(h, inv_b):
    # BatchNorm1d in training mode with gamma=1, beta=0 (module init), + ReLU.
    # Two-pass (numerically safe) biased variance: mean, then E[(h-mean)^2].
    mean = jnp.sum(h, axis=0, keepdims=True) * inv_b
    d = h - mean
    var = jnp.sum(d * d, axis=0, keepdims=True) * inv_b
    h = d * jax.lax.rsqrt(var + BN_EPS)
    return jnp.maximum(h, 0.0)


def mlp_kernel(x_ref, w1_ref, w2_ref, w3_ref, w4_ref, w5_ref, b5_ref, o_ref):
    # All operands are already resident in VMEM (auto-DMA'd concurrently in
    # the pallas_call prologue). x is bf16; weights are bf16; bias/output f32.
    inv_b = 1.0 / x_ref.shape[0]

    # Layer 1
    h = jnp.dot(x_ref[...], w1_ref[...], preferred_element_type=jnp.float32)
    h = _bn_relu(h, inv_b)

    # Layer 2
    h = jnp.dot(h.astype(jnp.bfloat16), w2_ref[...],
                preferred_element_type=jnp.float32)
    h = _bn_relu(h, inv_b)

    # Layer 3
    h = jnp.dot(h.astype(jnp.bfloat16), w3_ref[...],
                preferred_element_type=jnp.float32)
    h = _bn_relu(h, inv_b)

    # Layer 4
    h = jnp.dot(h.astype(jnp.bfloat16), w4_ref[...],
                preferred_element_type=jnp.float32)
    h = _bn_relu(h, inv_b)

    # Layer 5 (linear, with bias; bias kept in f32)
    out = jnp.dot(h.astype(jnp.bfloat16), w5_ref[...],
                  preferred_element_type=jnp.float32)
    o_ref[...] = out + b5_ref[...]


@functools.partial(jax.jit, static_argnames=("n_outputs",))
def mlp_partialize_forward(x, w1, w2, w3, w4, w5, b5, *, n_outputs):
    """x: [B, n_inputs] f32.  wK: padded bf16 [in_pad, out_pad] from
    prepare_params.  b5: f32 [1, out_pad].  Returns [B, n_outputs] f32."""
    B = x.shape[0]
    if x.shape[1] != w1.shape[0]:
        x = jnp.pad(x, ((0, 0), (0, w1.shape[0] - x.shape[1])))
    # Pre-cast x to bf16 on the host side of the kernel (halves its DMA).
    x = x.astype(jnp.bfloat16)
    n_out_pad = w5.shape[1]

    ws = (w1, w2, w3, w4, w5)
    flops = 2 * B * sum(w.shape[0] * w.shape[1] for w in ws)
    bytes_accessed = (x.size * 2 + sum(w.size * 2 for w in ws)
                      + b5.size * 4 + B * n_out_pad * 4)
    # 4 BN layers -> one rsqrt per feature column.
    transcendentals = sum(w.shape[1] for w in ws[:4])

    vmem = pl.BlockSpec(memory_space=pltpu.MemorySpace.VMEM)

    out_pad = pl.pallas_call(
        mlp_kernel,
        out_shape=jax.ShapeDtypeStruct((B, n_out_pad), jnp.float32),
        in_specs=[vmem] * 7,
        out_specs=vmem,
        cost_estimate=pl.CostEstimate(
            flops=flops,
            transcendentals=transcendentals,
            bytes_accessed=bytes_accessed,
        ),
    )(x, w1, w2, w3, w4, w5, b5)
    # Drop the lane padding on the output features.
    return out_pad[:, :n_outputs]


def xavier_uniform(key, fan_in, fan_out):
    # Matches torch.nn.init.xavier_uniform_ for a Linear weight [out, in];
    # returned pre-transposed as [in, out].
    bound = math.sqrt(6.0 / (fan_in + fan_out))
    return jax.random.uniform(key, (fan_in, fan_out), dtype=jnp.float32,
                              minval=-bound, maxval=bound)


def make_params(key, n_inputs, n_outputs):
    dims = [n_inputs, 300, 301, 302, 303, n_outputs]
    keys = jax.random.split(key, 5)
    ws = [xavier_uniform(keys[i], dims[i], dims[i + 1]) for i in range(5)]
    b5 = jnp.zeros((1, n_outputs), dtype=jnp.float32)  # init.zeros_
    return ws, b5


def prepare_params(ws, b5):
    """One-time host prep: zero-pad every hidden/output dim to a multiple of
    128 lanes (first in-dim to a multiple of 16 sublanes for bf16) and cast
    weights to bf16.  Bias stays f32."""
    in_dims = [w.shape[0] for w in ws]
    out_dims = [w.shape[1] for w in ws]
    pad_in = [_round_up(in_dims[0], 16)] + [_round_up(d, 128) for d in in_dims[1:]]
    pad_out = [_round_up(d, 128) for d in out_dims]
    wp = tuple(_pad2d(w, pad_in[i], pad_out[i]).astype(jnp.bfloat16)
               for i, w in enumerate(ws))
    b5p = _pad2d(b5, 1, pad_out[-1]).astype(jnp.float32)
    return wp, b5p


def reference_forward(x, wp, b5p, n_outputs):
    # Pure-JAX reference using the same padded bf16 weights / f32 accumulation.
    h = jnp.pad(x, ((0, 0), (0, wp[0].shape[0] - x.shape[1])))
    h = h.astype(jnp.bfloat16)
    for i, w in enumerate(wp):
        h = jnp.dot(h, w, preferred_element_type=jnp.float32)
        if i < 4:
            mean = jnp.mean(h, axis=0, keepdims=True)
            var = jnp.mean((h - mean) ** 2, axis=0, keepdims=True)
            h = jnp.maximum((h - mean) * jax.lax.rsqrt(var + BN_EPS), 0.0)
            h = h.astype(jnp.bfloat16)
    return (h + b5p)[:, :n_outputs]


if __name__ == "__main__":
    n_inputs, n_outputs, batch = 32, 10, 8

    key = jax.random.PRNGKey(0)
    kx, kp = jax.random.split(key)
    x = jax.random.normal(kx, (batch, n_inputs), dtype=jnp.float32)
    ws, b5 = make_params(kp, n_inputs, n_outputs)
    (w1, w2, w3, w4, w5), b5p = prepare_params(ws, b5)

    out = mlp_partialize_forward(x, w1, w2, w3, w4, w5, b5p,
                                 n_outputs=n_outputs)
    jax.block_until_ready(out)

    ref = reference_forward(x, (w1, w2, w3, w4, w5), b5p, n_outputs)
    assert out.shape == (batch, n_outputs)
    assert out.dtype == jnp.float32
    assert bool(jnp.all(jnp.isfinite(out)))
    assert bool(jnp.allclose(out, ref, rtol=2e-2, atol=2e-2)), \
        float(jnp.max(jnp.abs(out - ref)))
    print("KERNEL_OK")
</pallas_src>

<mosaic_0001>
module attributes {stable_mosaic.version = 11 : i64} {
  func.func @mlp_kernel(%arg0: memref<8x32xbf16, #tpu.memory_space<vmem>>, %arg1: memref<32x384xbf16, #tpu.memory_space<vmem>>, %arg2: memref<384x384xbf16, #tpu.memory_space<vmem>>, %arg3: memref<384x384xbf16, #tpu.memory_space<vmem>>, %arg4: memref<384x384xbf16, #tpu.memory_space<vmem>>, %arg5: memref<384x128xbf16, #tpu.memory_space<vmem>>, %arg6: memref<1x128xf32, #tpu.memory_space<vmem>>, %arg7: memref<8x128xf32, #tpu.memory_space<vmem>>) attributes {dimension_semantics = [], scalar_prefetch = 0 : i64, scratch_operands = 0 : i64, tpu.core_type = #tpu.core_type<tc>} {
    %c0 = arith.constant 0 : index
    %c0_0 = arith.constant 0 : index
    %0 = vector.load %arg0[%c0, %c0_0] : memref<8x32xbf16, #tpu.memory_space<vmem>>, vector<8x32xbf16>
    %c0_1 = arith.constant 0 : index
    %c0_2 = arith.constant 0 : index
    %1 = vector.load %arg1[%c0_1, %c0_2] : memref<32x384xbf16, #tpu.memory_space<vmem>>, vector<32x384xbf16>
    %cst = arith.constant dense<0.000000e+00> : vector<8x384xf32>
    %2 = tpu.matmul %0, %1, %cst {dimension_numbers = #tpu.dot_dimension_numbers<[1], [0], [0], [1], [0, 0, 1, 1], [], []>} : vector<8x32xbf16>, vector<32x384xbf16>, vector<8x384xf32> -> vector<8x384xf32>
    %cst_3 = arith.constant dense<0.000000e+00> : vector<384xf32>
    %3 = vector.multi_reduction <add>, %2, %cst_3 [0] : vector<8x384xf32> to vector<384xf32>
    %4 = vector.shape_cast %3 : vector<384xf32> to vector<1x384xf32>
    %cst_4 = arith.constant 1.250000e-01 : f32
    %5 = vector.broadcast %cst_4 : f32 to vector<1x384xf32>
    %6 = arith.mulf %4, %5 : vector<1x384xf32>
    %7 = vector.broadcast %6 : vector<1x384xf32> to vector<8x384xf32>
    %8 = arith.subf %2, %7 : vector<8x384xf32>
    %9 = arith.mulf %8, %8 : vector<8x384xf32>
    %cst_5 = arith.constant dense<0.000000e+00> : vector<384xf32>
    %10 = vector.multi_reduction <add>, %9, %cst_5 [0] : vector<8x384xf32> to vector<384xf32>
    %11 = vector.shape_cast %10 : vector<384xf32> to vector<1x384xf32>
    %cst_6 = arith.constant 1.250000e-01 : f32
    %12 = vector.broadcast %cst_6 : f32 to vector<1x384xf32>
    %13 = arith.mulf %11, %12 : vector<1x384xf32>
    %cst_7 = arith.constant 9.99999974E-6 : f32
    %14 = vector.broadcast %cst_7 : f32 to vector<1x384xf32>
    %15 = arith.addf %13, %14 : vector<1x384xf32>
    %16 = math.rsqrt %15 : vector<1x384xf32>
    %17 = vector.broadcast %16 : vector<1x384xf32> to vector<8x384xf32>
    %18 = arith.mulf %8, %17 : vector<8x384xf32>
    %cst_8 = arith.constant 0.000000e+00 : f32
    %19 = vector.broadcast %cst_8 : f32 to vector<8x384xf32>
    %20 = arith.maximumf %18, %19 : vector<8x384xf32>
    %21 = arith.truncf %20 : vector<8x384xf32> to vector<8x384xbf16>
    %c0_9 = arith.constant 0 : index
    %c0_10 = arith.constant 0 : index
    %22 = vector.load %arg2[%c0_9, %c0_10] : memref<384x384xbf16, #tpu.memory_space<vmem>>, vector<384x384xbf16>
    %cst_11 = arith.constant dense<0.000000e+00> : vector<8x384xf32>
    %23 = tpu.matmul %21, %22, %cst_11 {dimension_numbers = #tpu.dot_dimension_numbers<[1], [0], [0], [1], [0, 0, 1, 1], [], []>} : vector<8x384xbf16>, vector<384x384xbf16>, vector<8x384xf32> -> vector<8x384xf32>
    %cst_12 = arith.constant dense<0.000000e+00> : vector<384xf32>
    %24 = vector.multi_reduction <add>, %23, %cst_12 [0] : vector<8x384xf32> to vector<384xf32>
    %25 = vector.shape_cast %24 : vector<384xf32> to vector<1x384xf32>
    %cst_13 = arith.constant 1.250000e-01 : f32
    %26 = vector.broadcast %cst_13 : f32 to vector<1x384xf32>
    %27 = arith.mulf %25, %26 : vector<1x384xf32>
    %28 = vector.broadcast %27 : vector<1x384xf32> to vector<8x384xf32>
    %29 = arith.subf %23, %28 : vector<8x384xf32>
    %30 = arith.mulf %29, %29 : vector<8x384xf32>
    %cst_14 = arith.constant dense<0.000000e+00> : vector<384xf32>
    %31 = vector.multi_reduction <add>, %30, %cst_14 [0] : vector<8x384xf32> to vector<384xf32>
    %32 = vector.shape_cast %31 : vector<384xf32> to vector<1x384xf32>
    %cst_15 = arith.constant 1.250000e-01 : f32
    %33 = vector.broadcast %cst_15 : f32 to vector<1x384xf32>
    %34 = arith.mulf %32, %33 : vector<1x384xf32>
    %cst_16 = arith.constant 9.99999974E-6 : f32
    %35 = vector.broadcast %cst_16 : f32 to vector<1x384xf32>
    %36 = arith.addf %34, %35 : vector<1x384xf32>
    %37 = math.rsqrt %36 : vector<1x384xf32>
    %38 = vector.broadcast %37 : vector<1x384xf32> to vector<8x384xf32>
    %39 = arith.mulf %29, %38 : vector<8x384xf32>
    %cst_17 = arith.constant 0.000000e+00 : f32
    %40 = vector.broadcast %cst_17 : f32 to vector<8x384xf32>
    %41 = arith.maximumf %39, %40 : vector<8x384xf32>
    %42 = arith.truncf %41 : vector<8x384xf32> to vector<8x384xbf16>
    %c0_18 = arith.constant 0 : index
    %c0_19 = arith.constant 0 : index
    %43 = vector.load %arg3[%c0_18, %c0_19] : memref<384x384xbf16, #tpu.memory_space<vmem>>, vector<384x384xbf16>
    %cst_20 = arith.constant dense<0.000000e+00> : vector<8x384xf32>
    %44 = tpu.matmul %42, %43, %cst_20 {dimension_numbers = #tpu.dot_dimension_numbers<[1], [0], [0], [1], [0, 0, 1, 1], [], []>} : vector<8x384xbf16>, vector<384x384xbf16>, vector<8x384xf32> -> vector<8x384xf32>
    %cst_21 = arith.constant dense<0.000000e+00> : vector<384xf32>
    %45 = vector.multi_reduction <add>, %44, %cst_21 [0] : vector<8x384xf32> to vector<384xf32>
    %46 = vector.shape_cast %45 : vector<384xf32> to vector<1x384xf32>
    %cst_22 = arith.constant 1.250000e-01 : f32
    %47 = vector.broadcast %cst_22 : f32 to vector<1x384xf32>
    %48 = arith.mulf %46, %47 : vector<1x384xf32>
    %49 = vector.broadcast %48 : vector<1x384xf32> to vector<8x384xf32>
    %50 = arith.subf %44, %49 : vector<8x384xf32>
    %51 = arith.mulf %50, %50 : vector<8x384xf32>
    %cst_23 = arith.constant dense<0.000000e+00> : vector<384xf32>
    %52 = vector.multi_reduction <add>, %51, %cst_23 [0] : vector<8x384xf32> to vector<384xf32>
    %53 = vector.shape_cast %52 : vector<384xf32> to vector<1x384xf32>
    %cst_24 = arith.constant 1.250000e-01 : f32
    %54 = vector.broadcast %cst_24 : f32 to vector<1x384xf32>
    %55 = arith.mulf %53, %54 : vector<1x384xf32>
    %cst_25 = arith.constant 9.99999974E-6 : f32
    %56 = vector.broadcast %cst_25 : f32 to vector<1x384xf32>
    %57 = arith.addf %55, %56 : vector<1x384xf32>
    %58 = math.rsqrt %57 : vector<1x384xf32>
    %59 = vector.broadcast %58 : vector<1x384xf32> to vector<8x384xf32>
    %60 = arith.mulf %50, %59 : vector<8x384xf32>
    %cst_26 = arith.constant 0.000000e+00 : f32
    %61 = vector.broadcast %cst_26 : f32 to vector<8x384xf32>
    %62 = arith.maximumf %60, %61 : vector<8x384xf32>
    %63 = arith.truncf %62 : vector<8x384xf32> to vector<8x384xbf16>
    %c0_27 = arith.constant 0 : index
    %c0_28 = arith.constant 0 : index
    %64 = vector.load %arg4[%c0_27, %c0_28] : memref<384x384xbf16, #tpu.memory_space<vmem>>, vector<384x384xbf16>
    %cst_29 = arith.constant dense<0.000000e+00> : vector<8x384xf32>
    %65 = tpu.matmul %63, %64, %cst_29 {dimension_numbers = #tpu.dot_dimension_numbers<[1], [0], [0], [1], [0, 0, 1, 1], [], []>} : vector<8x384xbf16>, vector<384x384xbf16>, vector<8x384xf32> -> vector<8x384xf32>
    %cst_30 = arith.constant dense<0.000000e+00> : vector<384xf32>
    %66 = vector.multi_reduction <add>, %65, %cst_30 [0] : vector<8x384xf32> to vector<384xf32>
    %67 = vector.shape_cast %66 : vector<384xf32> to vector<1x384xf32>
    %cst_31 = arith.constant 1.250000e-01 : f32
    %68 = vector.broadcast %cst_31 : f32 to vector<1x384xf32>
    %69 = arith.mulf %67, %68 : vector<1x384xf32>
    %70 = vector.broadcast %69 : vector<1x384xf32> to vector<8x384xf32>
    %71 = arith.subf %65, %70 : vector<8x384xf32>
    %72 = arith.mulf %71, %71 : vector<8x384xf32>
    %cst_32 = arith.constant dense<0.000000e+00> : vector<384xf32>
    %73 = vector.multi_reduction <add>, %72, %cst_32 [0] : vector<8x384xf32> to vector<384xf32>
    %74 = vector.shape_cast %73 : vector<384xf32> to vector<1x384xf32>
    %cst_33 = arith.constant 1.250000e-01 : f32
    %75 = vector.broadcast %cst_33 : f32 to vector<1x384xf32>
    %76 = arith.mulf %74, %75 : vector<1x384xf32>
    %cst_34 = arith.constant 9.99999974E-6 : f32
    %77 = vector.broadcast %cst_34 : f32 to vector<1x384xf32>
    %78 = arith.addf %76, %77 : vector<1x384xf32>
    %79 = math.rsqrt %78 : vector<1x384xf32>
    %80 = vector.broadcast %79 : vector<1x384xf32> to vector<8x384xf32>
    %81 = arith.mulf %71, %80 : vector<8x384xf32>
    %cst_35 = arith.constant 0.000000e+00 : f32
    %82 = vector.broadcast %cst_35 : f32 to vector<8x384xf32>
    %83 = arith.maximumf %81, %82 : vector<8x384xf32>
    %84 = arith.truncf %83 : vector<8x384xf32> to vector<8x384xbf16>
    %c0_36 = arith.constant 0 : index
    %c0_37 = arith.constant 0 : index
    %85 = vector.load %arg5[%c0_36, %c0_37] : memref<384x128xbf16, #tpu.memory_space<vmem>>, vector<384x128xbf16>
    %cst_38 = arith.constant dense<0.000000e+00> : vector<8x128xf32>
    %86 = tpu.matmul %84, %85, %cst_38 {dimension_numbers = #tpu.dot_dimension_numbers<[1], [0], [0], [1], [0, 0, 1, 1], [], []>} : vector<8x384xbf16>, vector<384x128xbf16>, vector<8x128xf32> -> vector<8x128xf32>
    %c0_39 = arith.constant 0 : index
    %c0_40 = arith.constant 0 : index
    %87 = vector.load %arg6[%c0_39, %c0_40] : memref<1x128xf32, #tpu.memory_space<vmem>>, vector<1x128xf32>
    %88 = vector.broadcast %87 : vector<1x128xf32> to vector<8x128xf32>
    %89 = arith.addf %86, %88 : vector<8x128xf32>
    %c0_41 = arith.constant 0 : index
    %c0_42 = arith.constant 0 : index
    %90 = vector.load %arg7[%c0_41, %c0_42] : memref<8x128xf32, #tpu.memory_space<vmem>>, vector<8x128xf32>
    tpu.vector_store %arg7[%c0_41, %c0_42], %89 {strides = array<i32>} : memref<8x128xf32, #tpu.memory_space<vmem>>, vector<8x128xf32>,
    return
  }
}

</mosaic_0001>

<bundles_post_ra>
// kernel: mlp_partialize_forward.1
= control target key start
LH: loop header
LB: loop body
LE: loop exit
PB: predicated region body
PF: predicated region fallthrough
CT: control target
= control target key end

     0   :  { %12 = vsyncpa [#allocation3], 0  ;;  %s3892_s0 = inlined_call_operand.vmem [shape: bf16[8,32], index: 0, kind: input, shape index: {}]   ;;  %s3893_s1 = inlined_call_operand.hbm [shape: bf16[32,384], index: 1, kind: input, shape index: {}]   ;;  %s3894_s2 = inlined_call_operand.hbm [shape: bf16[384,384], index: 2, kind: input, shape index: {}]   ;;  %s3895_s3 = inlined_call_operand.hbm [shape: bf16[384,384], index: 3, kind: input, shape index: {}]   ;;  %s3896_s4 = inlined_call_operand.hbm [shape: bf16[384,384], index: 4, kind: input, shape index: {}]   ;;  %s3897_s5 = inlined_call_operand.hbm [shape: bf16[384,128], index: 5, kind: input, shape index: {}]   ;;  %s3898_s6 = inlined_call_operand.vmem [shape: f32[1,128], index: 6, kind: input, shape index: {}]   ;;  %s3899_s7 = inlined_call_operand.hbm [shape: f32[8,128], index: 7, kind: output, shape index: {}]  }
   0x1   :  { %13 = vsyncpa [#allocation6], 0 }
   0x2   :  { %14 = vsyncpa [#allocation9], 0 }
   0x3   :  { %15 = vsyncpa [#allocation4], 0  ;;  %s3670_s24 = smov [#allocation5]   ;;  %s3671_s26 = smov [#allocation8]  }
   0x4   :  { %s35_s25 = sshll.u32 %s3670_s24, 4  ;;  %s59_s27 = sshll.u32 %s3671_s26, 4  ;;  %s36_s25 = int_to_ptr.vmem [resolvable:$true] %s35_s25  ;;  %s3723_s27 = int_to_ptr.vmem [resolvable:$true] %s59_s27 }
   0x5   :  { %s3530_s30 = scalar_lea.hbm %s3894_s2, 9216 }
   0x6   :  { %p3531_p0 = scmp.ne.s32.totalorder %s3894_s2, %s3530_s30  ;;  %p3534_p1 = scmp.lt.u32.totalorder %s3530_s30, %s3894_s2 }
   0x8   :  { %p3536_p2 = pnand %p3534_p1, %p3531_p0 }
   0xa   :  { %3539 = shalt.err (!%p3536_p2)
}
   0xb   :  { %s3540_s12 = scalar_lea.vmem %s36_s25, 9216  ;;  %p3545_p4 = scmp.lt.s32.totalorder %s36_s25, %s36_s25 }
   0xc   :  { %p3541_p3 = scmp.ne.s32.totalorder %s36_s25, %s3540_s12  ;;  %p3546_p5 = scmp.lt.s32.totalorder %s3540_s12, %s3540_s12 }
   0xe   :  { %p3547_p6 = por %p3546_p5, %p3545_p4 }
  0x10   :  { %p3548_p7 = pnand %p3547_p6, %p3541_p3 }
  0x12   :  { %3551 = shalt.err (!%p3548_p7)
}
  0x13   :  { %s3672_s13 = smov 192   ;;  %s3673_s14 = smov 12  }
  0x14   :  { %41 = dma.hbm_to_vmem [thread:$0]  %s3894_s2, 9216, %s36_s25, [#allocation6], %s3672_s13, %s3672_s13, %s3673_s14  }
  0x15   :  { %s3552_s19 = scalar_lea.hbm %s3896_s4, 9216 }
  0x16   :  { %p3553_p8 = scmp.ne.s32.totalorder %s3896_s4, %s3552_s19  ;;  %p3556_p9 = scmp.lt.u32.totalorder %s3552_s19, %s3896_s4 }
  0x18   :  { %p3558_p10 = pnand %p3556_p9, %p3553_p8 }
  0x1a   :  { %3561 = shalt.err (!%p3558_p10)
}
  0x1b   :  { %s3562_s24 = scalar_lea.vmem %s3723_s27, 9216  ;;  %p3567_p12 = scmp.lt.s32.totalorder %s3723_s27, %s3723_s27 }
  0x1c   :  { %p3563_p11 = scmp.ne.s32.totalorder %s3723_s27, %s3562_s24  ;;  %p3568_p13 = scmp.lt.s32.totalorder %s3562_s24, %s3562_s24 }
  0x1e   :  { %p3569_p0 = por %p3568_p13, %p3567_p12 }
  0x20   :  { %p3570_p1 = pnand %p3569_p0, %p3563_p11 }
  0x22   :  { %3573 = shalt.err (!%p3570_p1)
}
  0x23   :  { %65 = dma.hbm_to_vmem [thread:$0]  %s3896_s4, 9216, %s3723_s27, [#allocation9], %s3672_s13, %s3672_s13, %s3673_s14  }
  0x24   :  { %s3674_s26 = smov [#allocation2]   ;;  %s3675_s29 = smov [#allocation7]  }
  0x25   :  { %s23_s28 = sshll.u32 %s3674_s26, 4  ;;  %s47_s30 = sshll.u32 %s3675_s29, 4  ;;  %s24_s28 = int_to_ptr.vmem [resolvable:$true] %s23_s28  ;;  %s3760_s30 = int_to_ptr.vmem [resolvable:$true] %s47_s30 }
  0x26   :  { %s3574_s10 = scalar_lea.hbm %s3893_s1, 768 }
  0x27   :  { %p3575_p2 = scmp.ne.s32.totalorder %s3893_s1, %s3574_s10  ;;  %p3578_p3 = scmp.lt.u32.totalorder %s3574_s10, %s3893_s1 }
  0x29   :  { %p3580_p4 = pnand %p3578_p3, %p3575_p2 }
  0x2b   :  { %3583 = shalt.err (!%p3580_p4)
}
  0x2c   :  { %s3584_s4 = scalar_lea.vmem %s24_s28, 768  ;;  %p3589_p6 = scmp.lt.s32.totalorder %s24_s28, %s24_s28 }
  0x2d   :  { %p3585_p5 = scmp.ne.s32.totalorder %s24_s28, %s3584_s4  ;;  %p3590_p7 = scmp.lt.s32.totalorder %s3584_s4, %s3584_s4 }
  0x2f   :  { %p3591_p8 = por %p3590_p7, %p3589_p6 }
  0x31   :  { %p3592_p9 = pnand %p3591_p8, %p3585_p5 }
  0x33   :  { %3595 = shalt.err (!%p3592_p9)
}
  0x34   :  { %29 = dma.hbm_to_vmem [thread:$0]  %s3893_s1, 768, %s24_s28, [#allocation3], %s3672_s13, %s3672_s13, %s3673_s14  }
  0x35   :  { %s3596_s20 = scalar_lea.hbm %s3895_s3, 9216 }
  0x36   :  { %p3597_p10 = scmp.ne.s32.totalorder %s3895_s3, %s3596_s20  ;;  %p3600_p11 = scmp.lt.u32.totalorder %s3596_s20, %s3895_s3 }
  0x38   :  { %p3602_p12 = pnand %p3600_p11, %p3597_p10 }
  0x3a   :  { %3605 = shalt.err (!%p3602_p12)
}
  0x3b   :  { %s3606_s2 = scalar_lea.vmem %s3760_s30, 9216  ;;  %p3611_p0 = scmp.lt.s32.totalorder %s3760_s30, %s3760_s30 }
  0x3c   :  { %p3607_p13 = scmp.ne.s32.totalorder %s3760_s30, %s3606_s2  ;;  %p3612_p1 = scmp.lt.s32.totalorder %s3606_s2, %s3606_s2 }
  0x3e   :  { %p3613_p2 = por %p3612_p1, %p3611_p0 }
  0x40   :  { %p3614_p3 = pnand %p3613_p2, %p3607_p13 }
  0x42   :  { %3617 = shalt.err (!%p3614_p3)
}
  0x43   :  { %53 = dma.hbm_to_vmem [thread:$0]  %s3895_s3, 9216, %s3760_s30, [#allocation6], %s3672_s13, %s3672_s13, %s3673_s14  }
  0x44   :  { %s3676_s26 = smov [#allocation10]   ;;  %s3618_s9 = scalar_lea.hbm %s3897_s5, 3072 }
  0x45   :  { %s71_s28 = sshll.u32 %s3676_s26, 4  ;;  %p3619_p4 = scmp.ne.s32.totalorder %s3897_s5, %s3618_s9  ;;  %s72_s28 = int_to_ptr.vmem [resolvable:$true] %s71_s28 }
  0x46   :  { %p3622_p5 = scmp.lt.u32.totalorder %s3618_s9, %s3897_s5 }
  0x48   :  { %p3624_p6 = pnand %p3622_p5, %p3619_p4 }
  0x4a   :  { %3627 = shalt.err (!%p3624_p6)
}
  0x4b   :  { %s3628_s16 = scalar_lea.vmem %s72_s28, 3072  ;;  %p3633_p8 = scmp.lt.s32.totalorder %s72_s28, %s72_s28 }
  0x4c   :  { %p3629_p7 = scmp.ne.s32.totalorder %s72_s28, %s3628_s16  ;;  %p3634_p9 = scmp.lt.s32.totalorder %s3628_s16, %s3628_s16 }
  0x4e   :  { %p3635_p10 = por %p3634_p9, %p3633_p8 }
  0x50   :  { %p3636_p11 = pnand %p3635_p10, %p3629_p7 }
  0x52   :  { %3639 = shalt.err (!%p3636_p11)
}
  0x53   :  { %s3677_s3 = smov 64   ;;  %s3678_s13 = smov 4  }
  0x54   :  { %77 = dma.hbm_to_vmem [thread:$0]  %s3897_s5, 3072, %s72_s28, [#allocation9], %s3677_s3, %s3677_s3, %s3678_s13  }
  0x55   :  { %3662 = dma.done.wait [#allocation3], 768  }
  0x56   :  { %3663 = vsyncadd [#allocation3], 4294966528 }
  0x57   :  { %3664 = dma.done.wait [#allocation6], 18432  }
  0x58   :  { %3665 = vsyncadd [#allocation6], 4294948864 }
  0x59   :  { %3666 = dma.done.wait [#allocation9], 12288  }
  0x5a   :  { %3667 = vsyncadd [#allocation9], 4294955008  ;;  %v3679_v0 = vmov 0   ;;  %v3186_v1 = vld [vmem:[#allocation2 + $0x4] ss:$12 sps:$4 sm:$0xff]   ;;  %vm137_vm0 = vcmask 261120  }
  0x5b   :  { %173 = vmatprep.mubr.bf16.mxu1 %v3679_v0  ;;  %v3188_v2 = vld [vmem:[#allocation2] ss:$12 sps:$4 sm:$0xff]   ;;  %141 = vmatprep.subr.bf16.mxu1 %v3186_v1  ;;  %v3189_v3 = vld [vmem:[#allocation2 + $0x1c] ss:$12 sps:$4 sm:$0xff]   ;;  %v3191_v4 = vld [vmem:[#allocation2 + $0x18] ss:$12 sps:$4 sm:$0xff]  }
  0x5c   :  { %142 = vmatpush1.bf16.msra.mxu1 %v3188_v2  ;;  %v96_v5 = vld [vmem:[%s3892_s0] sm:$0xf]  ;;  %v3194_v6 = vld [vmem:[#allocation5 + $0x4] ss:$12 sps:$4 sm:$0xff]   ;;  %v3196_v7 = vld [vmem:[#allocation5] ss:$12 sps:$4 sm:$0xff]  }
  0x5d   :  { %143 = vmatprep.subr.bf16.mxu1 %v3189_v3  ;;  %v3192_v8 = vld [vmem:[#allocation2 + $0x8] ss:$12 sps:$4 sm:$0xff]   ;;  %765 = vmatprep.subr.bf16.mxu0 %v3194_v6  ;;  %v3197_v9 = vld [vmem:[#allocation5 + $0x1c] ss:$12 sps:$4 sm:$0xff]   ;;  %v3680_v10 = vmov 0.0   ;;  %vm3681_vm1 = vmmov 0  }
  0x5e   :  { %766 = vmatpush1.bf16.msra.mxu0 %v3196_v7  ;;  %v3199_v11 = vld [vmem:[#allocation5 + $0x18] ss:$12 sps:$4 sm:$0xff]   ;;  %v3200_v12 = vld [vmem:[#allocation5 + $0x34] ss:$12 sps:$4 sm:$0xff]   ;;  %v3193_v13 = vld [vmem:[#allocation2 + $0x20] ss:$12 sps:$4 sm:$0xff]  }
  0x5f   :  { %767 = vmatprep.subr.bf16.mxu0 %v3197_v9  ;;  %v3202_v14 = vld [vmem:[#allocation5 + $0x30] ss:$12 sps:$4 sm:$0xff]   ;;  %v3203_v15 = vld [vmem:[#allocation5 + $0x4c] ss:$12 sps:$4 sm:$0xff]   ;;  %v3205_v16 = vld [vmem:[#allocation5 + $0x48] ss:$12 sps:$4 sm:$0xff]  }
  0x60   :  { %144 = vmatpush1.bf16.msra.mxu1 %v3191_v4  ;;  %v3206_v17 = vld [vmem:[#allocation5 + $0x64] ss:$12 sps:$4 sm:$0xff]   ;;  %v3208_v18 = vld [vmem:[#allocation5 + $0x60] ss:$12 sps:$4 sm:$0xff]   ;;  %v3209_v19 = vld [vmem:[#allocation5 + $0x7c] ss:$12 sps:$4 sm:$0xff]  }
  0x61   :  { %3073 = vmatprep.subr.bf16.mxu1 %v3680_v10  ;;  %v3211_v20 = vld [vmem:[#allocation5 + $0x78] ss:$12 sps:$4 sm:$0xff]   ;;  %v3212_v21 = vld [vmem:[#allocation5 + $0x94] ss:$12 sps:$4 sm:$0xff]   ;;  %v3214_v22 = vld [vmem:[#allocation5 + $0x90] ss:$12 sps:$4 sm:$0xff]  }
  0x62   :  { %768 = vmatpush1.bf16.msra.mxu0 %v3199_v11  ;;  %v3215_v23 = vld [vmem:[#allocation5 + $0xac] ss:$12 sps:$4 sm:$0xff]   ;;  %v3217_v24 = vld [vmem:[#allocation5 + $0xa8] ss:$12 sps:$4 sm:$0xff]   ;;  %v3218_v25 = vld [vmem:[#allocation5 + $0xc4] ss:$12 sps:$4 sm:$0xff]  }
  0x63   :  { %2703 = vmatmul.mubr.msk.bf16.vlgmr.msra.gmra.mrb[0].mxu1 %vm137_vm0, %v96_v5  ;;  %769 = vmatprep.subr.bf16.mxu0 %v3200_v12  ;;  %v3220_v26 = vld [vmem:[#allocation5 + $0xc8] ss:$12 sps:$4 sm:$0xff]   ;;  %v3221_v27 = vld [vmem:[#allocation5 + $0xc0] ss:$12 sps:$4 sm:$0xff]   ;;  %v3226_v31 = vld [vmem:[#allocation5 + $0xd8] ss:$12 sps:$4 sm:$0xff]  }
  0x64   :  { %3074 = vmatpush3.bf16.msra.mxu1 %v3192_v8  ;;  %3077 = vmatprep.mubr.msk.bf16.mxu1 %vm3681_vm1, %v3680_v10  ;;  %v3222_v28 = vld [vmem:[#allocation5 + $0x8] ss:$12 sps:$4 sm:$0xff]   ;;  %v3225_v30 = vld [vmem:[#allocation5 + $0xe0] ss:$12 sps:$4 sm:$0xff]   ;;  %v3230_v34 = vld [vmem:[#allocation5 + $0xf8] ss:$12 sps:$4 sm:$0xff]  }
  0x65   :  { %3075 = vmatprep.subr.bf16.mxu1 %v3680_v10  ;;  %v3223_v29 = vld [vmem:[#allocation5 + $0xdc] ss:$12 sps:$4 sm:$0xff]   ;;  %v3227_v32 = vld [vmem:[#allocation5 + $0x20] ss:$12 sps:$4 sm:$0xff]   ;;  %v3232_v36 = vld [vmem:[#allocation5 + $0x38] ss:$12 sps:$4 sm:$0xff]  }
  0x66   :  { %770 = vmatpush1.bf16.msra.mxu0 %v3202_v14  ;;  %v3228_v33 = vld [vmem:[#allocation5 + $0xf4] ss:$12 sps:$4 sm:$0xff]   ;;  %v3231_v35 = vld [vmem:[#allocation5 + $0xf0] ss:$12 sps:$4 sm:$0xff]   ;;  %v3233_v37 = vld [vmem:[#allocation5 + $0x10c] ss:$12 sps:$4 sm:$0xff]  }
  0x67   :  { %771 = vmatprep.subr.bf16.mxu0 %v3203_v15  ;;  %v3235_v38 = vld [vmem:[#allocation5 + $0x110] ss:$12 sps:$4 sm:$0xff]   ;;  %v3236_v39 = vld [vmem:[#allocation5 + $0x108] ss:$12 sps:$4 sm:$0xff]   ;;  %v3241_v43 = vld [vmem:[#allocation5 + $0x120] ss:$12 sps:$4 sm:$0xff]  }
  0x68   :  { %3076 = vmatpush3.bf16.msra.mxu1 %v3193_v13  ;;  %v3237_v40 = vld [vmem:[#allocation5 + $0x50] ss:$12 sps:$4 sm:$0xff]   ;;  %v3240_v42 = vld [vmem:[#allocation5 + $0x128] ss:$12 sps:$4 sm:$0xff]   ;;  %v3245_v46 = vld [vmem:[#allocation5 + $0x140] ss:$12 sps:$4 sm:$0xff]  }
  0x69   :  { %2949 = vmatprep.subr.bf16.mxu1 %v3220_v26  ;;  %v3238_v41 = vld [vmem:[#allocation5 + $0x124] ss:$12 sps:$4 sm:$0xff]   ;;  %v3242_v44 = vld [vmem:[#allocation5 + $0x68] ss:$12 sps:$4 sm:$0xff]   ;;  %v3247_v48 = vld [vmem:[#allocation5 + $0x80] ss:$12 sps:$4 sm:$0xff]  }
  0x6a   :  { %772 = vmatpush1.bf16.msra.mxu0 %v3205_v16  ;;  %v3243_v45 = vld [vmem:[#allocation5 + $0x13c] ss:$12 sps:$4 sm:$0xff]   ;;  %v3246_v47 = vld [vmem:[#allocation5 + $0x138] ss:$12 sps:$4 sm:$0xff]   ;;  %v3248_v49 = vld [vmem:[#allocation5 + $0x154] ss:$12 sps:$4 sm:$0xff]  }
  0x6b   :  { %3078 = vmatmul.mubr.msk.bf16.vlgmr.msra.gmra.mrb[4].mxu1 %vm137_vm0, %v96_v5  ;;  %773 = vmatprep.subr.bf16.mxu0 %v3206_v17  ;;  %v3250_v50 = vld [vmem:[#allocation5 + $0x158] ss:$12 sps:$4 sm:$0xff]   ;;  %v3251_v51 = vld [vmem:[#allocation5 + $0x150] ss:$12 sps:$4 sm:$0xff]   ;;  %v3256_v55 = vld [vmem:[#allocation5 + $0x168] ss:$12 sps:$4 sm:$0xff]  }
  0x6c   :  { %2950 = vmatpush3.bf16.msra.mxu1 %v3222_v28  ;;  %v3252_v52 = vld [vmem:[#allocation5 + $0x98] ss:$12 sps:$4 sm:$0xff]   ;;  %v3255_v54 = vld [vmem:[#allocation5 + $0x170] ss:$12 sps:$4 sm:$0xff]   ;;  %s3682_s17 = smov [#allocation11]  }
  0x6d   :  { %2951 = vmatprep.subr.bf16.mxu1 %v3225_v30  ;;  %v3253_v53 = vld [vmem:[#allocation5 + $0x16c] ss:$12 sps:$4 sm:$0xff]   ;;  %v3257_v56 = vld [vmem:[#allocation5 + $0xb0] ss:$12 sps:$4 sm:$0xff]   ;;  %s2686_s18 = sshll.u32 %s3682_s17, 4  ;;  %s2687_s18 = int_to_ptr.vmem [resolvable:$true] %s2686_s18 }
  0x6e   :  { %774 = vmatpush1.bf16.msra.mxu0 %v3208_v18  ;;  %v3260_v57 = vld [vmem:[#allocation5 + $0x184] ss:$12 sps:$4 sm:$0xff]   ;;  %s3640_s19 = scalar_lea.vmem %s2687_s18, 128  ;;  %p3645_p13 = scmp.lt.s32.totalorder %s2687_s18, %s2687_s18 }
  0x6f   :  { %775 = vmatprep.subr.bf16.mxu0 %v3209_v19  ;;  %p3641_p12 = scmp.ne.s32.totalorder %s2687_s18, %s3640_s19  ;;  %p3646_p0 = scmp.lt.s32.totalorder %s3640_s19, %s3640_s19 }
  0x70   :  { %2952 = vmatpush3.bf16.msra.mxu1 %v3227_v32 }
  0x71   :  { %2953 = vmatprep.subr.bf16.mxu1 %v3230_v34  ;;  %p3647_p1 = por %p3646_p0, %p3645_p13 }
  0x72   :  { %776 = vmatpush1.bf16.msra.mxu0 %v3211_v20 }
  0x73   :  { %777 = vmatprep.subr.bf16.mxu0 %v3212_v21  ;;  %p3648_p2 = pnand %p3647_p1, %p3641_p12 }
  0x74   :  { %2954 = vmatpush3.bf16.msra.mxu1 %v3232_v36 }
  0x75   :  { %2955 = vmatprep.subr.bf16.mxu1 %v3235_v38 }
  0x76   :  { %778 = vmatpush1.bf16.msra.mxu0 %v3214_v22 }
  0x77   :  { %779 = vmatprep.subr.bf16.mxu0 %v3215_v23 }
  0x78   :  { %2956 = vmatpush3.bf16.msra.mxu1 %v3237_v40 }
  0x79   :  { %2957 = vmatprep.subr.bf16.mxu1 %v3240_v42 }
  0x7a   :  { %780 = vmatpush1.bf16.msra.mxu0 %v3217_v24 }
  0x7b   :  { %781 = vmatprep.subr.bf16.mxu0 %v3218_v25 }
  0x7c   :  { %2958 = vmatpush3.bf16.msra.mxu1 %v3242_v44 }
  0x7d   :  { %2959 = vmatprep.subr.bf16.mxu1 %v3245_v46 }
  0x7e   :  { %782 = vmatpush1.bf16.msra.mxu0 %v3221_v27 }
  0x7f   :  { %783 = vmatprep.subr.bf16.mxu0 %v3223_v29 }
  0x80   :  { %2960 = vmatpush3.bf16.msra.mxu1 %v3247_v48 }
  0x81   :  { %2961 = vmatprep.subr.bf16.mxu1 %v3250_v50 }
  0x82   :  { %784 = vmatpush1.bf16.msra.mxu0 %v3226_v31 }
  0x83   :  { %785 = vmatprep.subr.bf16.mxu0 %v3228_v33 }
  0x84   :  { %2962 = vmatpush3.bf16.msra.mxu1 %v3252_v52 }
  0x85   :  { %2963 = vmatprep.subr.bf16.mxu1 %v3255_v54 }
  0x86   :  { %786 = vmatpush1.bf16.msra.mxu0 %v3231_v35 }
  0x87   :  { %787 = vmatprep.subr.bf16.mxu0 %v3233_v37 }
  0x88   :  { %2964 = vmatpush3.bf16.msra.mxu1 %v3257_v56 }
  0x89   :  { %3081 = vmatprep.subr.bf16.mxu1 %v3680_v10 }
  0x8a   :  { %788 = vmatpush1.bf16.msra.mxu0 %v3236_v39 }
  0x8b   :  { %789 = vmatprep.subr.bf16.mxu0 %v3238_v41 }
  0x8e   :  { %790 = vmatpush1.bf16.msra.mxu0 %v3241_v43 }
  0x8f   :  { %791 = vmatprep.subr.bf16.mxu0 %v3243_v45 }
  0x92   :  { %792 = vmatpush1.bf16.msra.mxu0 %v3246_v47 }
  0x93   :  { %793 = vmatprep.subr.bf16.mxu0 %v3248_v49 }
  0x96   :  { %794 = vmatpush1.bf16.msra.mxu0 %v3251_v51 }
  0x97   :  { %795 = vmatprep.subr.bf16.mxu0 %v3253_v53 }
  0x9a   :  { %796 = vmatpush1.bf16.msra.mxu0 %v3256_v55 }
  0x9b   :  { %806 = vmatprep.subr.bf16.mxu0 %v3260_v57 }
 0x136   :  { %v175_v58 = vpop.f32.mrb[0].mxu1 }
 0x137   :  { %v222_v59 = vrot.slane %v175_v58, 4  ;;  %v177_v60 = vpop.f32.mrb[1].mxu1 }
 0x138   :  { %v228_v61 = vrot.slane %v177_v60, 4  ;;  %v179_v62 = vpop.f32.mrb[2].mxu1 }
 0x139   :  { %v223_v63 = vadd.f32 %v222_v59, %v175_v58  ;;  %v180_v1 = vpop.f32.mrb[3].mxu1 }
 0x13a   :  { %v229_v2 = vadd.f32 %v228_v61, %v177_v60  ;;  %v3261_v61 = vld [vmem:[#allocation5 + $0x188] ss:$12 sps:$4 sm:$0xff]  }
 0x13b   :  { %v224_v3 = vrot.slane %v223_v63, 2 }
 0x13c   :  { %v230_v4 = vrot.slane %v229_v2, 2 }
 0x13d   :  { %v225_v5 = vadd.f32 %v224_v3, %v223_v63  ;;  %v3264_v63 = vld [vmem:[#allocation5 + $0x19c] ss:$12 sps:$4 sm:$0xff]   ;;  %v3265_v3 = vld [vmem:[#allocation5 + $0x1a0] ss:$12 sps:$4 sm:$0xff]  }
 0x13e   :  { %v231_v6 = vadd.f32 %v230_v4, %v229_v2  ;;  %v216_v7 = vpop.f32.mrb[4].mxu1  ;;  %v3262_v2 = vld [vmem:[#allocation5 + $0x198] ss:$12 sps:$4 sm:$0xff]   ;;  %v3268_v4 = vld [vmem:[#allocation5 + $0x1b4] ss:$12 sps:$4 sm:$0xff]  }
 0x13f   :  { %v226_v8 = vrot.slane %v225_v5, 1  ;;  %v234_v9 = vrot.slane %v216_v7, 4  ;;  %v3079_v11 = vpop.f32.mrb[5].mxu1 }
 0x140   :  { %v232_v12 = vrot.slane %v231_v6, 1  ;;  %v219_v13 = vpop.f32.mrb[6].mxu1  ;;  %v3273_v11 = vld [vmem:[#allocation5 + $0x1d0] ss:$12 sps:$4 sm:$0xff]  }
 0x141   :  { %v227_v14 = vadd.f32 %v226_v8, %v225_v5  ;;  %v235_v15 = vadd.f32 %v234_v9, %v216_v7  ;;  %v3080_v16 = vpop.f32.mrb[7].mxu1  ;;  %v3272_v8 = vld [vmem:[#allocation5 + $0x1cc] ss:$12 sps:$4 sm:$0xff]   ;;  %v3270_v9 = vld [vmem:[#allocation5 + $0x1c8] ss:$12 sps:$4 sm:$0xff]  }
 0x142   :  { %v233_v17 = vadd.f32 %v232_v12, %v231_v6  ;;  %v3266_v6 = vld [vmem:[#allocation5 + $0x1b0] ss:$12 sps:$4 sm:$0xff]   ;;  %v3274_v13 = vld [vmem:[#allocation5 + $0x1e0] ss:$12 sps:$4 sm:$0xff]   ;;  %v3278_v16 = vld [vmem:[#allocation5 + $0x1f8] ss:$12 sps:$4 sm:$0xff]  }
 0x143   :  { %v240_v18 = vmul.f32 0.125, %v227_v14  ;;  %v236_v19 = vrot.slane %v235_v15, 2  ;;  %v3276_v12 = vld [vmem:[#allocation5 + $0x1e4] ss:$12 sps:$4 sm:$0xff]   ;;  %v3277_v14 = vld [vmem:[#allocation5 + $0x1e8] ss:$12 sps:$4 sm:$0xff]  }
 0x144   :  { %v241_v20 = vmul.f32 0.125, %v233_v17  ;;  %v3281_v17 = vld [vmem:[#allocation5 + $0x200] ss:$12 sps:$4 sm:$0xff]  }
 0x145   :  { %v243_v21 = vsub.f32 %v175_v58, %v240_v18  ;;  %v237_v22 = vadd.f32 %v236_v19, %v235_v15  ;;  %v3280_v15 = vld [vmem:[#allocation5 + $0x1fc] ss:$12 sps:$4 sm:$0xff]   ;;  %v3284_v18 = vld [vmem:[#allocation5 + $0x214] ss:$12 sps:$4 sm:$0xff]  }
 0x146   :  { %v244_v23 = vsub.f32 %v177_v60, %v241_v20  ;;  %v3258_v60 = vld [vmem:[#allocation5 + $0x180] ss:$12 sps:$4 sm:$0xff]   ;;  %v3282_v20 = vld [vmem:[#allocation5 + $0x210] ss:$12 sps:$4 sm:$0xff]  }
 0x147   :  { %v246_v24 = vmul.f32 %v243_v21, %v243_v21  ;;  %v238_v25 = vrot.slane %v237_v22, 1 }
 0x148   :  { %v247_v26 = vmul.f32 %v244_v23, %v244_v23 }
 0x149   :  { %v249_v27 = vrot.slane %v246_v24, 4  ;;  %v239_v28 = vadd.f32 %v238_v25, %v237_v22  ;;  %v3289_v25 = vld [vmem:[#allocation5 + $0x230] ss:$12 sps:$4 sm:$0xff]  }
 0x14a   :  { %v255_v29 = vrot.slane %v247_v26, 4 }
 0x14b   :  { %v250_v30 = vadd.f32 %v249_v27, %v246_v24  ;;  %v242_v31 = vmul.f32 0.125, %v239_v28  ;;  %v3286_v24 = vld [vmem:[#allocation5 + $0x228] ss:$12 sps:$4 sm:$0xff]   ;;  %v3290_v28 = vld [vmem:[#allocation7] ss:$12 sps:$4 sm:$0xff]  }
 0x14c   :  { %v256_v32 = vadd.f32 %v255_v29, %v247_v26  ;;  %v3292_v29 = vld [vmem:[#allocation7 + $0x4] ss:$12 sps:$4 sm:$0xff]  }
 0x14d   :  { %v251_v33 = vrot.slane %v250_v30, 2  ;;  %v3820_v34 = vsub.f32 %v216_v7, %v242_v31  ;;  %v3269_v7 = vld [vmem:[#allocation5 + $0x1b8] ss:$12 sps:$4 sm:$0xff]  }
 0x14e   :  { %v257_v35 = vrot.slane %v256_v32, 2  ;;  %v3293_v31 = vld [vmem:[#allocation7 + $0x18] ss:$12 sps:$4 sm:$0xff]  }
 0x14f   :  { %v252_v36 = vadd.f32 %v251_v33, %v250_v30  ;;  %v248_v39 = vmul.f32 %v3820_v34, %v3820_v34  ;;  %v3295_v30 = vld [vmem:[#allocation7 + $0x1c] ss:$12 sps:$4 sm:$0xff]  }
 0x150   :  { %v258_v37 = vadd.f32 %v257_v35, %v256_v32  ;;  %v3298_v32 = vld [vmem:[#allocation7 + $0x34] ss:$12 sps:$4 sm:$0xff]   ;;  %v3296_v33 = vld [vmem:[#allocation7 + $0x30] ss:$12 sps:$4 sm:$0xff]  }
 0x151   :  { %v253_v38 = vrot.slane %v252_v36, 1  ;;  %v261_v44 = vrot.slane %v248_v39, 4  ;;  %v3299_v35 = vld [vmem:[#allocation7 + $0x48] ss:$12 sps:$4 sm:$0xff]  }
 0x152   :  { %v259_v40 = vrot.slane %v258_v37, 1 }
 0x153   :  { %v254_v41 = vadd.f32 %v253_v38, %v252_v36  ;;  %v262_v48 = vadd.f32 %v261_v44, %v248_v39  ;;  %v3304_v36 = vld [vmem:[#allocation7 + $0x64] ss:$12 sps:$4 sm:$0xff]   ;;  %v3307_v38 = vld [vmem:[#allocation7 + $0x7c] ss:$12 sps:$4 sm:$0xff]  }
 0x154   :  { %v260_v42 = vadd.f32 %v259_v40, %v258_v37  ;;  %v3302_v37 = vld [vmem:[#allocation7 + $0x60] ss:$12 sps:$4 sm:$0xff]   ;;  %v3305_v39 = vld [vmem:[#allocation7 + $0x78] ss:$12 sps:$4 sm:$0xff]  }
 0x155   :  { %v267_v43 = vmul.f32 0.125, %v254_v41  ;;  %v263_v49 = vrot.slane %v262_v48, 2  ;;  %v3310_v40 = vld [vmem:[#allocation7 + $0x94] ss:$12 sps:$4 sm:$0xff]   ;;  %v3308_v41 = vld [vmem:[#allocation7 + $0x90] ss:$12 sps:$4 sm:$0xff]  }
 0x156   :  { %v268_v45 = vmul.f32 0.125, %v260_v42  ;;  %v3313_v42 = vld [vmem:[#allocation7 + $0xac] ss:$12 sps:$4 sm:$0xff]   ;;  %v3316_v44 = vld [vmem:[#allocation7 + $0xc4] ss:$12 sps:$4 sm:$0xff]  }
 0x157   :  { %v270_v46 = vadd.f32 1e-05, %v267_v43  ;;  %v264_v50 = vadd.f32 %v263_v49, %v262_v48  ;;  %v3311_v43 = vld [vmem:[#allocation7 + $0xa8] ss:$12 sps:$4 sm:$0xff]   ;;  %v3322_v49 = vld [vmem:[#allocation7 + $0xe0] ss:$12 sps:$4 sm:$0xff]  }
 0x158   :  { %v271_v47 = vadd.f32 1e-05, %v268_v45  ;;  %v3317_v45 = vld [vmem:[#allocation7 + $0xc8] ss:$12 sps:$4 sm:$0xff]  }
 0x159   :  { %3506 = vrsqrt.f32 %v270_v46  ;;  %v265_v54 = vrot.slane %v264_v50, 1  ;;  %v3314_v46 = vld [vmem:[#allocation7 + $0xc0] ss:$12 sps:$4 sm:$0xff]   ;;  %v3321_v48 = vld [vmem:[#allocation7 + $0xdc] ss:$12 sps:$4 sm:$0xff]  }
 0x15a   :  { %3508 = vrsqrt.f32 %v271_v47  ;;  %v3318_v47 = vld [vmem:[#allocation7 + $0x8] ss:$12 sps:$4 sm:$0xff]  }
 0x15b   :  { %v266_v58 = vadd.f32 %v265_v54, %v264_v50  ;;  %v3319_v50 = vld [vmem:[#allocation7 + $0xd8] ss:$12 sps:$4 sm:$0xff]   ;;  %v3324_v54 = vld [vmem:[#allocation7 + $0xf0] ss:$12 sps:$4 sm:$0xff]  }
 0x15d   :  { %v269_v1 = vmul.f32 0.125, %v266_v58  ;;  %v3329_v58 = vld [vmem:[#allocation7 + $0x108] ss:$12 sps:$4 sm:$0xff]  }
 0x15f   :  { %v272_v5 = vadd.f32 1e-05, %v269_v1  ;;  %v3341_v1 = vld [vmem:[#allocation7 + $0x13c] ss:$12 sps:$4 sm:$0xff]  }
 0x161   :  { %3510 = vrsqrt.f32 %v272_v5  ;;  %v3346_v5 = vld [vmem:[#allocation7 + $0x154] ss:$12 sps:$4 sm:$0xff]  }
 0x163   :  { %v3507_v51 = vpop.eup %3506 }
 0x164   :  { %v3509_v52 = vpop.eup %3508  ;;  %v276_v53 = vmul.f32 %v3507_v51, %v243_v21  ;;  %v3285_v21 = vld [vmem:[#allocation5 + $0x218] ss:$12 sps:$4 sm:$0xff]   ;;  %v3323_v51 = vld [vmem:[#allocation7 + $0x20] ss:$12 sps:$4 sm:$0xff]  }
 0x165   :  { %v277_v55 = vmul.f32 %v3509_v52, %v244_v23  ;;  %v3288_v23 = vld [vmem:[#allocation5 + $0x22c] ss:$12 sps:$4 sm:$0xff]   ;;  %v3326_v52 = vld [vmem:[#allocation7 + $0xf4] ss:$12 sps:$4 sm:$0xff]  }
 0x166   :  { %v279_v56 = vmax.f32 %v276_v53, 0.0  ;;  %v3327_v53 = vld [vmem:[#allocation7 + $0xf8] ss:$12 sps:$4 sm:$0xff]  }
 0x167   :  { %v280_v57 = vmax.f32 %v277_v55, 0.0  ;;  %v3328_v55 = vld [vmem:[#allocation7 + $0x38] ss:$12 sps:$4 sm:$0xff]  }
 0x168   :  { %v282_v62 = vpack.c.bf16 %v279_v56, %v279_v56  ;;  %v3331_v56 = vld [vmem:[#allocation7 + $0x10c] ss:$12 sps:$4 sm:$0xff]  }
 0x169   :  { %v283_v59 = vpack.c.bf16 %v280_v57, %v280_v57  ;;  %v3332_v57 = vld [vmem:[#allocation7 + $0x110] ss:$12 sps:$4 sm:$0xff]  }
 0x16b   :  { %797 = vmatprep.mubr.bf16.mxu0 %v283_v59  ;;  %879 = vmatprep.mubr.bf16.mxu1 %v283_v59  ;;  %v3511_v19 = vpop.eup %3510  ;;  %v3333_v59 = vld [vmem:[#allocation7 + $0x50] ss:$12 sps:$4 sm:$0xff]  }
 0x16c   :  { %798 = vmatmul.mubr.bf16.vlgmr.msra.gmra.mrb[0].mxu0 %v282_v62  ;;  %880 = vmatmul.mubr.bf16.vlgmr.msra.gmra.mrb[8].mxu1 %v282_v62  ;;  %v278_v22 = vmul.f32 %v3511_v19, %v3820_v34  ;;  %v3301_v34 = vld [vmem:[#allocation7 + $0x4c] ss:$12 sps:$4 sm:$0xff]  }
 0x16d   :  { %807 = vmatpush1.bf16.msra.mxu0 %v3258_v60  ;;  %3082 = vmatpush3.bf16.msra.mxu1 %v3261_v61  ;;  %v3336_v60 = vld [vmem:[#allocation7 + $0x124] ss:$12 sps:$4 sm:$0xff]   ;;  %v3337_v61 = vld [vmem:[#allocation7 + $0x128] ss:$12 sps:$4 sm:$0xff]   ;;  %v3334_v62 = vld [vmem:[#allocation7 + $0x120] ss:$12 sps:$4 sm:$0xff]  }
 0x16e   :  { %808 = vmatprep.subr.bf16.mxu0 %v3264_v63  ;;  %3083 = vmatprep.subr.bf16.mxu1 %v3680_v10  ;;  %v281_v26 = vmax.f32 %v278_v22, 0.0  ;;  %v3338_v63 = vld [vmem:[#allocation7 + $0x68] ss:$12 sps:$4 sm:$0xff]  }
 0x16f   :  { %838 = vmatprep.mubr.bf16.mxu0 %v3679_v0  ;;  %3097 = vmatprep.mubr.msk.bf16.mxu1 %vm3681_vm1, %v3680_v10 }
 0x170   :  { %v284_v27 = vpack.c.bf16 %v281_v26, %v281_v26 }
 0x171   :  { %809 = vmatpush1.bf16.msra.mxu0 %v3262_v2  ;;  %3084 = vmatpush3.bf16.msra.mxu1 %v3265_v3  ;;  %v3342_v2 = vld [vmem:[#allocation7 + $0x140] ss:$12 sps:$4 sm:$0xff]   ;;  %v3339_v3 = vld [vmem:[#allocation7 + $0x138] ss:$12 sps:$4 sm:$0xff]  }
 0x172   :  { %810 = vmatprep.subr.bf16.mxu0 %v3268_v4  ;;  %3085 = vmatprep.subr.bf16.mxu1 %v3680_v10  ;;  %v3343_v4 = vld [vmem:[#allocation7 + $0x80] ss:$12 sps:$4 sm:$0xff]  }
 0x175   :  { %811 = vmatpush1.bf16.msra.mxu0 %v3266_v6  ;;  %3086 = vmatpush3.bf16.msra.mxu1 %v3269_v7  ;;  %v3347_v6 = vld [vmem:[#allocation7 + $0x158] ss:$12 sps:$4 sm:$0xff]   ;;  %v3344_v7 = vld [vmem:[#allocation7 + $0x150] ss:$12 sps:$4 sm:$0xff]  }
 0x176   :  { %812 = vmatprep.subr.bf16.mxu0 %v3272_v8  ;;  %3087 = vmatprep.subr.bf16.mxu1 %v3680_v10  ;;  %v3348_v8 = vld [vmem:[#allocation7 + $0x98] ss:$12 sps:$4 sm:$0xff]  }
 0x179   :  { %813 = vmatpush1.bf16.msra.mxu0 %v3270_v9  ;;  %3088 = vmatpush3.bf16.msra.mxu1 %v3273_v11  ;;  %v3351_v9 = vld [vmem:[#allocation7 + $0x16c] ss:$12 sps:$4 sm:$0xff]   ;;  %v3352_v11 = vld [vmem:[#allocation7 + $0x170] ss:$12 sps:$4 sm:$0xff]  }
 0x17a   :  { %814 = vmatprep.subr.bf16.mxu0 %v3276_v12  ;;  %3089 = vmatprep.subr.bf16.mxu1 %v3680_v10  ;;  %v3349_v12 = vld [vmem:[#allocation7 + $0x168] ss:$12 sps:$4 sm:$0xff]  }
 0x17d   :  { %815 = vmatpush1.bf16.msra.mxu0 %v3274_v13  ;;  %3090 = vmatpush3.bf16.msra.mxu1 %v3277_v14  ;;  %v3353_v13 = vld [vmem:[#allocation7 + $0xb0] ss:$12 sps:$4 sm:$0xff]  }
 0x17e   :  { %816 = vmatprep.subr.bf16.mxu0 %v3280_v15  ;;  %3091 = vmatprep.subr.bf16.mxu1 %v3680_v10  ;;  %v3356_v14 = vld [vmem:[#allocation7 + $0x184] ss:$12 sps:$4 sm:$0xff]  }
 0x181   :  { %817 = vmatpush1.bf16.msra.mxu0 %v3278_v16  ;;  %3092 = vmatpush3.bf16.msra.mxu1 %v3281_v17 }
 0x182   :  { %818 = vmatprep.subr.bf16.mxu0 %v3284_v18  ;;  %3093 = vmatprep.subr.bf16.mxu1 %v3680_v10 }
 0x185   :  { %819 = vmatpush1.bf16.msra.mxu0 %v3282_v20  ;;  %3094 = vmatpush3.bf16.msra.mxu1 %v3285_v21 }
 0x186   :  { %820 = vmatprep.subr.bf16.mxu0 %v3288_v23  ;;  %3095 = vmatprep.subr.bf16.mxu1 %v3680_v10 }
 0x189   :  { %821 = vmatpush1.bf16.msra.mxu0 %v3286_v24  ;;  %3096 = vmatpush3.bf16.msra.mxu1 %v3289_v25 }
 0x18a   :  { %1470 = vmatprep.subr.bf16.mxu1 %v3292_v29  ;;  %2980 = vmatprep.subr.bf16.mxu0 %v3317_v45 }
 0x18c   :  { %839 = vmatmul.mubr.bf16.vlgmr.msra.gmra.mrb[0].mxu0 %v284_v27  ;;  %3098 = vmatmul.mubr.bf16.vlgmr.msra.gmra.mrb[12].mxu1 %v284_v27 }
 0x18d   :  { %1471 = vmatpush1.bf16.msra.mxu1 %v3290_v28  ;;  %2981 = vmatpush3.bf16.msra.mxu0 %v3318_v47 }
 0x18e   :  { %1472 = vmatprep.subr.bf16.mxu1 %v3295_v30  ;;  %2982 = vmatprep.subr.bf16.mxu0 %v3322_v49 }
 0x191   :  { %1473 = vmatpush1.bf16.msra.mxu1 %v3293_v31  ;;  %2983 = vmatpush3.bf16.msra.mxu0 %v3323_v51 }
 0x192   :  { %1474 = vmatprep.subr.bf16.mxu1 %v3298_v32  ;;  %2984 = vmatprep.subr.bf16.mxu0 %v3327_v53 }
 0x195   :  { %1475 = vmatpush1.bf16.msra.mxu1 %v3296_v33  ;;  %2985 = vmatpush3.bf16.msra.mxu0 %v3328_v55 }
 0x196   :  { %1476 = vmatprep.subr.bf16.mxu1 %v3301_v34  ;;  %2986 = vmatprep.subr.bf16.mxu0 %v3332_v57 }
 0x199   :  { %1477 = vmatpush1.bf16.msra.mxu1 %v3299_v35  ;;  %2987 = vmatpush3.bf16.msra.mxu0 %v3333_v59 }
 0x19a   :  { %1478 = vmatprep.subr.bf16.mxu1 %v3304_v36  ;;  %2988 = vmatprep.subr.bf16.mxu0 %v3337_v61 }
 0x19d   :  { %1479 = vmatpush1.bf16.msra.mxu1 %v3302_v37  ;;  %2989 = vmatpush3.bf16.msra.mxu0 %v3338_v63 }
 0x19e   :  { %1480 = vmatprep.subr.bf16.mxu1 %v3307_v38  ;;  %2990 = vmatprep.subr.bf16.mxu0 %v3342_v2 }
 0x1a1   :  { %1481 = vmatpush1.bf16.msra.mxu1 %v3305_v39  ;;  %2991 = vmatpush3.bf16.msra.mxu0 %v3343_v4 }
 0x1a2   :  { %1482 = vmatprep.subr.bf16.mxu1 %v3310_v40  ;;  %2992 = vmatprep.subr.bf16.mxu0 %v3347_v6 }
 0x1a5   :  { %1483 = vmatpush1.bf16.msra.mxu1 %v3308_v41  ;;  %2993 = vmatpush3.bf16.msra.mxu0 %v3348_v8 }
 0x1a6   :  { %1484 = vmatprep.subr.bf16.mxu1 %v3313_v42  ;;  %2994 = vmatprep.subr.bf16.mxu0 %v3352_v11 }
 0x1a9   :  { %1485 = vmatpush1.bf16.msra.mxu1 %v3311_v43  ;;  %2995 = vmatpush3.bf16.msra.mxu0 %v3353_v13 }
 0x1aa   :  { %1486 = vmatprep.subr.bf16.mxu1 %v3316_v44  ;;  %3101 = vmatprep.subr.bf16.mxu0 %v3680_v10 }
 0x1ad   :  { %1487 = vmatpush1.bf16.msra.mxu1 %v3314_v46 }
 0x1ae   :  { %1488 = vmatprep.subr.bf16.mxu1 %v3321_v48 }
 0x1b1   :  { %1489 = vmatpush1.bf16.msra.mxu1 %v3319_v50 }
 0x1b2   :  { %1490 = vmatprep.subr.bf16.mxu1 %v3326_v52 }
 0x1b5   :  { %1491 = vmatpush1.bf16.msra.mxu1 %v3324_v54 }
 0x1b6   :  { %1492 = vmatprep.subr.bf16.mxu1 %v3331_v56 }
 0x1b9   :  { %1493 = vmatpush1.bf16.msra.mxu1 %v3329_v58 }
 0x1ba   :  { %1494 = vmatprep.subr.bf16.mxu1 %v3336_v60 }
 0x1bd   :  { %1495 = vmatpush1.bf16.msra.mxu1 %v3334_v62 }
 0x1be   :  { %1496 = vmatprep.subr.bf16.mxu1 %v3341_v1 }
 0x1c1   :  { %1497 = vmatpush1.bf16.msra.mxu1 %v3339_v3 }
 0x1c2   :  { %1498 = vmatprep.subr.bf16.mxu1 %v3346_v5 }
 0x1c5   :  { %1499 = vmatpush1.bf16.msra.mxu1 %v3344_v7 }
 0x1c6   :  { %1500 = vmatprep.subr.bf16.mxu1 %v3351_v9 }
 0x1c9   :  { %1501 = vmatpush1.bf16.msra.mxu1 %v3349_v12 }
 0x1ca   :  { %1511 = vmatprep.subr.bf16.mxu1 %v3356_v14 }
 0x23f   :  { %v2965_v15 = vpop.f32.mrb[8].mxu1 }
 0x240   :  { %v2966_v16 = vpop.f32.mrb[9].mxu1 }
 0x241   :  { %v2967_v17 = vadd.f32 %v2966_v16, %v2965_v15  ;;  %v2968_v18 = vpop.f32.mrb[10].mxu1 }
 0x242   :  { %v2969_v19 = vpop.f32.mrb[11].mxu1 }
 0x25f   :  { %v840_v20 = vpop.f32.mrb[0].mxu0  ;;  %v921_v21 = vpop.f32.mrb[12].mxu1 }
 0x260   :  { %v927_v22 = vrot.slane %v840_v20, 4  ;;  %v922_v23 = vadd.f32 %v2967_v17, %v921_v21  ;;  %v842_v24 = vpop.f32.mrb[1].mxu0  ;;  %v3099_v25 = vpop.f32.mrb[13].mxu1 }
 0x261   :  { %v933_v26 = vrot.slane %v842_v24, 4  ;;  %v844_v27 = vpop.f32.mrb[2].mxu0  ;;  %v924_v28 = vpop.f32.mrb[14].mxu1 }
 0x262   :  { %v928_v29 = vadd.f32 %v927_v22, %v840_v20  ;;  %v939_v30 = vrot.slane %v922_v23, 4  ;;  %v845_v31 = vpop.f32.mrb[3].mxu0  ;;  %v3100_v32 = vpop.f32.mrb[15].mxu1  ;;  %v3358_v28 = vld [vmem:[#allocation7 + $0x198] ss:$12 sps:$4 sm:$0xff]  }
 0x263   :  { %v934_v33 = vadd.f32 %v933_v26, %v842_v24  ;;  %v3360_v26 = vld [vmem:[#allocation7 + $0x19c] ss:$12 sps:$4 sm:$0xff]  }
 0x264   :  { %v929_v34 = vrot.slane %v928_v29, 2  ;;  %v940_v35 = vadd.f32 %v939_v30, %v922_v23  ;;  %v3364_v30 = vld [vmem:[#allocation7 + $0x1b4] ss:$12 sps:$4 sm:$0xff]   ;;  %v3362_v32 = vld [vmem:[#allocation7 + $0x1b0] ss:$12 sps:$4 sm:$0xff]  }
 0x265   :  { %v935_v36 = vrot.slane %v934_v33, 2 }
 0x266   :  { %v930_v37 = vadd.f32 %v929_v34, %v928_v29  ;;  %v941_v38 = vrot.slane %v940_v35, 2  ;;  %v3361_v29 = vld [vmem:[#allocation7 + $0x1a0] ss:$12 sps:$4 sm:$0xff]  }
 0x267   :  { %v936_v39 = vadd.f32 %v935_v36, %v934_v33  ;;  %v3365_v33 = vld [vmem:[#allocation7 + $0x1b8] ss:$12 sps:$4 sm:$0xff]   ;;  %v3369_v36 = vld [vmem:[#allocation7 + $0x1d0] ss:$12 sps:$4 sm:$0xff]  }
 0x268   :  { %v931_v40 = vrot.slane %v930_v37, 1  ;;  %v942_v41 = vadd.f32 %v941_v38, %v940_v35  ;;  %v3368_v34 = vld [vmem:[#allocation7 + $0x1cc] ss:$12 sps:$4 sm:$0xff]   ;;  %v3366_v35 = vld [vmem:[#allocation7 + $0x1c8] ss:$12 sps:$4 sm:$0xff]  }
 0x269   :  { %v937_v42 = vrot.slane %v936_v39, 1  ;;  %v3370_v38 = vld [vmem:[#allocation7 + $0x1e0] ss:$12 sps:$4 sm:$0xff]  }
 0x26a   :  { %v932_v43 = vadd.f32 %v931_v40, %v930_v37  ;;  %v943_v44 = vrot.slane %v942_v41, 1  ;;  %v3372_v37 = vld [vmem:[#allocation7 + $0x1e4] ss:$12 sps:$4 sm:$0xff]   ;;  %v3376_v40 = vld [vmem:[#allocation7 + $0x1fc] ss:$12 sps:$4 sm:$0xff]  }
 0x26b   :  { %v938_v45 = vadd.f32 %v937_v42, %v936_v39  ;;  %v3373_v39 = vld [vmem:[#allocation7 + $0x1e8] ss:$12 sps:$4 sm:$0xff]   ;;  %v3377_v42 = vld [vmem:[#allocation7 + $0x200] ss:$12 sps:$4 sm:$0xff]  }
 0x26c   :  { %v945_v46 = vmul.f32 0.125, %v932_v43  ;;  %v944_v49 = vadd.f32 %v943_v44, %v942_v41  ;;  %v3374_v41 = vld [vmem:[#allocation7 + $0x1f8] ss:$12 sps:$4 sm:$0xff]   ;;  %v3380_v43 = vld [vmem:[#allocation7 + $0x214] ss:$12 sps:$4 sm:$0xff]  }
 0x26d   :  { %v946_v47 = vmul.f32 0.125, %v938_v45  ;;  %v3378_v45 = vld [vmem:[#allocation7 + $0x210] ss:$12 sps:$4 sm:$0xff]  }
 0x26e   :  { %v948_v48 = vsub.f32 %v840_v20, %v945_v46  ;;  %v947_v54 = vmul.f32 0.125, %v944_v49  ;;  %v3381_v46 = vld [vmem:[#allocation7 + $0x218] ss:$12 sps:$4 sm:$0xff]   ;;  %v3382_v49 = vld [vmem:[#allocation7 + $0x228] ss:$12 sps:$4 sm:$0xff]  }
 0x26f   :  { %v949_v50 = vsub.f32 %v842_v24, %v946_v47  ;;  %v3357_v24 = vld [vmem:[#allocation7 + $0x188] ss:$12 sps:$4 sm:$0xff]  }
 0x270   :  { %v951_v51 = vmul.f32 %v948_v48, %v948_v48  ;;  %v3836_v59 = vsub.f32 %v922_v23, %v947_v54  ;;  %v3354_v23 = vld [vmem:[#allocation7 + $0x180] ss:$12 sps:$4 sm:$0xff]   ;;  %v3388_v54 = vld [vmem:[#allocation8 + $0x4] ss:$12 sps:$4 sm:$0xff]  }
 0x271   :  { %v952_v52 = vmul.f32 %v949_v50, %v949_v50 }
 0x272   :  { %v954_v53 = vrot.slane %v951_v51, 4  ;;  %v953_v1 = vmul.f32 %v3836_v59, %v3836_v59 }
 0x273   :  { %v960_v55 = vrot.slane %v952_v52, 4 }
 0x274   :  { %v955_v56 = vadd.f32 %v954_v53, %v951_v51  ;;  %v966_v6 = vrot.slane %v953_v1, 4  ;;  %v3386_v53 = vld [vmem:[#allocation8] ss:$12 sps:$4 sm:$0xff]  }
 0x275   :  { %v961_v57 = vadd.f32 %v960_v55, %v952_v52  ;;  %v3391_v55 = vld [vmem:[#allocation8 + $0x1c] ss:$12 sps:$4 sm:$0xff]  }
 0x276   :  { %v956_v58 = vrot.slane %v955_v56, 2  ;;  %v967_v11 = vadd.f32 %v966_v6, %v953_v1  ;;  %v3401_v1 = vld [vmem:[#allocation8 + $0x78] ss:$12 sps:$4 sm:$0xff]  }
 0x277   :  { %v962_v60 = vrot.slane %v961_v57, 2  ;;  %v3412_v6 = vld [vmem:[#allocation8 + $0xc4] ss:$12 sps:$4 sm:$0xff]  }
 0x278   :  { %v957_v61 = vadd.f32 %v956_v58, %v955_v56  ;;  %v968_v12 = vrot.slane %v967_v11, 2  ;;  %v3389_v56 = vld [vmem:[#allocation8 + $0x18] ss:$12 sps:$4 sm:$0xff]   ;;  %v3392_v58 = vld [vmem:[#allocation8 + $0x30] ss:$12 sps:$4 sm:$0xff]  }
 0x279   :  { %v963_v62 = vadd.f32 %v962_v60, %v961_v57  ;;  %v3394_v57 = vld [vmem:[#allocation8 + $0x34] ss:$12 sps:$4 sm:$0xff]  }
 0x27a   :  { %v958_v63 = vrot.slane %v957_v61, 1  ;;  %v969_v13 = vadd.f32 %v968_v12, %v967_v11  ;;  %v3395_v60 = vld [vmem:[#allocation8 + $0x48] ss:$12 sps:$4 sm:$0xff]   ;;  %v3418_v12 = vld [vmem:[#allocation8 + $0xe0] ss:$12 sps:$4 sm:$0xff]  }
 0x27b   :  { %v964_v2 = vrot.slane %v963_v62, 1  ;;  %v3417_v11 = vld [vmem:[#allocation8 + $0xdc] ss:$12 sps:$4 sm:$0xff]  }
 0x27c   :  { %v959_v3 = vadd.f32 %v958_v63, %v957_v61  ;;  %v970_v17 = vrot.slane %v969_v13, 1  ;;  %v3400_v61 = vld [vmem:[#allocation8 + $0x64] ss:$12 sps:$4 sm:$0xff]   ;;  %v3403_v63 = vld [vmem:[#allocation8 + $0x7c] ss:$12 sps:$4 sm:$0xff]  }
 0x27d   :  { %v965_v4 = vadd.f32 %v964_v2, %v963_v62  ;;  %v3398_v62 = vld [vmem:[#allocation8 + $0x60] ss:$12 sps:$4 sm:$0xff]  }
 0x27e   :  { %v972_v5 = vmul.f32 0.125, %v959_v3  ;;  %v971_v21 = vadd.f32 %v970_v17, %v969_v13  ;;  %v3406_v2 = vld [vmem:[#allocation8 + $0x94] ss:$12 sps:$4 sm:$0xff]   ;;  %v3404_v3 = vld [vmem:[#allocation8 + $0x90] ss:$12 sps:$4 sm:$0xff]  }
 0x27f   :  { %v973_v7 = vmul.f32 0.125, %v965_v4  ;;  %v3409_v4 = vld [vmem:[#allocation8 + $0xac] ss:$12 sps:$4 sm:$0xff]   ;;  %v3420_v17 = vld [vmem:[#allocation8 + $0xf0] ss:$12 sps:$4 sm:$0xff]  }
 0x280   :  { %v975_v8 = vadd.f32 1e-05, %v972_v5  ;;  %v974_v27 = vmul.f32 0.125, %v971_v21  ;;  %v3407_v5 = vld [vmem:[#allocation8 + $0xa8] ss:$12 sps:$4 sm:$0xff]  }
 0x281   :  { %v976_v9 = vadd.f32 1e-05, %v973_v7  ;;  %v3413_v7 = vld [vmem:[#allocation8 + $0xc8] ss:$12 sps:$4 sm:$0xff]   ;;  %v3415_v13 = vld [vmem:[#allocation8 + $0xd8] ss:$12 sps:$4 sm:$0xff]  }
 0x282   :  { %3512 = vrsqrt.f32 %v975_v8  ;;  %v977_v31 = vadd.f32 1e-05, %v974_v27  ;;  %v3410_v8 = vld [vmem:[#allocation8 + $0xc0] ss:$12 sps:$4 sm:$0xff]   ;;  %v3425_v21 = vld [vmem:[#allocation8 + $0x108] ss:$12 sps:$4 sm:$0xff]  }
 0x283   :  { %3514 = vrsqrt.f32 %v976_v9  ;;  %v3414_v9 = vld [vmem:[#allocation8 + $0x8] ss:$12 sps:$4 sm:$0xff]  }
 0x284   :  { %3516 = vrsqrt.f32 %v977_v31  ;;  %v3437_v27 = vld [vmem:[#allocation8 + $0x13c] ss:$12 sps:$4 sm:$0xff]   ;;  %v3442_v31 = vld [vmem:[#allocation8 + $0x154] ss:$12 sps:$4 sm:$0xff]  }
 0x28c   :  { %v3513_v14 = vpop.eup %3512 }
 0x28d   :  { %v3515_v15 = vpop.eup %3514  ;;  %v981_v16 = vmul.f32 %v3513_v14, %v948_v48  ;;  %v3384_v48 = vld [vmem:[#allocation7 + $0x22c] ss:$12 sps:$4 sm:$0xff]  }
 0x28e   :  { %v982_v18 = vmul.f32 %v3515_v15, %v949_v50  ;;  %v3517_v44 = vpop.eup %3516  ;;  %v3385_v50 = vld [vmem:[#allocation7 + $0x230] ss:$12 sps:$4 sm:$0xff]   ;;  %v3419_v14 = vld [vmem:[#allocation8 + $0x20] ss:$12 sps:$4 sm:$0xff]  }
 0x28f   :  { %v984_v19 = vmax.f32 %v981_v16, 0.0  ;;  %v983_v47 = vmul.f32 %v3517_v44, %v3836_v59  ;;  %v3397_v59 = vld [vmem:[#allocation8 + $0x4c] ss:$12 sps:$4 sm:$0xff]   ;;  %v3422_v15 = vld [vmem:[#allocation8 + $0xf4] ss:$12 sps:$4 sm:$0xff]  }
 0x290   :  { %v985_v20 = vmax.f32 %v982_v18, 0.0  ;;  %v3423_v16 = vld [vmem:[#allocation8 + $0xf8] ss:$12 sps:$4 sm:$0xff]  }
 0x291   :  { %v987_v25 = vpack.c.bf16 %v984_v19, %v984_v19  ;;  %v986_v51 = vmax.f32 %v983_v47, 0.0  ;;  %v3424_v18 = vld [vmem:[#allocation8 + $0x38] ss:$12 sps:$4 sm:$0xff]  }
 0x292   :  { %v988_v22 = vpack.c.bf16 %v985_v20, %v985_v20  ;;  %v3427_v19 = vld [vmem:[#allocation8 + $0x10c] ss:$12 sps:$4 sm:$0xff]   ;;  %v3428_v20 = vld [vmem:[#allocation8 + $0x110] ss:$12 sps:$4 sm:$0xff]  }
 0x293   :  { %v989_v52 = vpack.c.bf16 %v986_v51, %v986_v51 }
 0x294   :  { %1502 = vmatprep.mubr.bf16.mxu1 %v988_v22  ;;  %1584 = vmatprep.mubr.bf16.mxu0 %v988_v22  ;;  %v3429_v22 = vld [vmem:[#allocation8 + $0x50] ss:$12 sps:$4 sm:$0xff]  }
 0x295   :  { %1503 = vmatmul.mubr.bf16.vlgmr.msra.gmra.mrb[16].mxu1 %v987_v25  ;;  %1585 = vmatmul.mubr.bf16.vlgmr.msra.gmra.mrb[4].mxu0 %v987_v25  ;;  %v3430_v25 = vld [vmem:[#allocation8 + $0x120] ss:$12 sps:$4 sm:$0xff]  }
 0x296   :  { %1512 = vmatpush1.bf16.msra.mxu1 %v3354_v23  ;;  %3102 = vmatpush3.bf16.msra.mxu0 %v3357_v24  ;;  %v3432_v23 = vld [vmem:[#allocation8 + $0x124] ss:$12 sps:$4 sm:$0xff]   ;;  %v3433_v24 = vld [vmem:[#allocation8 + $0x128] ss:$12 sps:$4 sm:$0xff]  }
 0x297   :  { %1513 = vmatprep.subr.bf16.mxu1 %v3360_v26  ;;  %3103 = vmatprep.subr.bf16.mxu0 %v3680_v10  ;;  %v3434_v26 = vld [vmem:[#allocation8 + $0x68] ss:$12 sps:$4 sm:$0xff]  }
 0x298   :  { %1543 = vmatprep.mubr.bf16.mxu1 %v3679_v0  ;;  %3117 = vmatprep.mubr.msk.bf16.mxu0 %vm3681_vm1, %v3680_v10 }
 0x29a   :  { %1514 = vmatpush1.bf16.msra.mxu1 %v3358_v28  ;;  %3104 = vmatpush3.bf16.msra.mxu0 %v3361_v29  ;;  %v3438_v28 = vld [vmem:[#allocation8 + $0x140] ss:$12 sps:$4 sm:$0xff]   ;;  %v3435_v29 = vld [vmem:[#allocation8 + $0x138] ss:$12 sps:$4 sm:$0xff]  }
 0x29b   :  { %1515 = vmatprep.subr.bf16.mxu1 %v3364_v30  ;;  %3105 = vmatprep.subr.bf16.mxu0 %v3680_v10  ;;  %v3439_v30 = vld [vmem:[#allocation8 + $0x80] ss:$12 sps:$4 sm:$0xff]  }
 0x29e   :  { %1516 = vmatpush1.bf16.msra.mxu1 %v3362_v32  ;;  %3106 = vmatpush3.bf16.msra.mxu0 %v3365_v33  ;;  %v3443_v32 = vld [vmem:[#allocation8 + $0x158] ss:$12 sps:$4 sm:$0xff]   ;;  %v3440_v33 = vld [vmem:[#allocation8 + $0x150] ss:$12 sps:$4 sm:$0xff]  }
 0x29f   :  { %1517 = vmatprep.subr.bf16.mxu1 %v3368_v34  ;;  %3107 = vmatprep.subr.bf16.mxu0 %v3680_v10  ;;  %v3444_v34 = vld [vmem:[#allocation8 + $0x98] ss:$12 sps:$4 sm:$0xff]  }
 0x2a2   :  { %1518 = vmatpush1.bf16.msra.mxu1 %v3366_v35  ;;  %3108 = vmatpush3.bf16.msra.mxu0 %v3369_v36  ;;  %v3447_v35 = vld [vmem:[#allocation8 + $0x16c] ss:$12 sps:$4 sm:$0xff]   ;;  %v3448_v36 = vld [vmem:[#allocation8 + $0x170] ss:$12 sps:$4 sm:$0xff]  }
 0x2a3   :  { %1519 = vmatprep.subr.bf16.mxu1 %v3372_v37  ;;  %3109 = vmatprep.subr.bf16.mxu0 %v3680_v10  ;;  %v3445_v37 = vld [vmem:[#allocation8 + $0x168] ss:$12 sps:$4 sm:$0xff]  }
 0x2a6   :  { %1520 = vmatpush1.bf16.msra.mxu1 %v3370_v38  ;;  %3110 = vmatpush3.bf16.msra.mxu0 %v3373_v39  ;;  %v3449_v38 = vld [vmem:[#allocation8 + $0xb0] ss:$12 sps:$4 sm:$0xff]  }
 0x2a7   :  { %1521 = vmatprep.subr.bf16.mxu1 %v3376_v40  ;;  %3111 = vmatprep.subr.bf16.mxu0 %v3680_v10  ;;  %v3452_v39 = vld [vmem:[#allocation8 + $0x184] ss:$12 sps:$4 sm:$0xff]  }
 0x2aa   :  { %1522 = vmatpush1.bf16.msra.mxu1 %v3374_v41  ;;  %3112 = vmatpush3.bf16.msra.mxu0 %v3377_v42 }
 0x2ab   :  { %1523 = vmatprep.subr.bf16.mxu1 %v3380_v43  ;;  %3113 = vmatprep.subr.bf16.mxu0 %v3680_v10 }
 0x2ae   :  { %1524 = vmatpush1.bf16.msra.mxu1 %v3378_v45  ;;  %3114 = vmatpush3.bf16.msra.mxu0 %v3381_v46 }
 0x2af   :  { %1525 = vmatprep.subr.bf16.mxu1 %v3384_v48  ;;  %3115 = vmatprep.subr.bf16.mxu0 %v3680_v10 }
 0x2b2   :  { %1526 = vmatpush1.bf16.msra.mxu1 %v3382_v49  ;;  %3116 = vmatpush3.bf16.msra.mxu0 %v3385_v50 }
 0x2b3   :  { %2175 = vmatprep.subr.bf16.mxu0 %v3388_v54  ;;  %3011 = vmatprep.subr.bf16.mxu1 %v3413_v7 }
 0x2b5   :  { %1544 = vmatmul.mubr.bf16.vlgmr.msra.gmra.mrb[16].mxu1 %v989_v52  ;;  %3118 = vmatmul.mubr.bf16.vlgmr.msra.gmra.mrb[8].mxu0 %v989_v52 }
 0x2b6   :  { %2176 = vmatpush1.bf16.msra.mxu0 %v3386_v53  ;;  %3012 = vmatpush3.bf16.msra.mxu1 %v3414_v9 }
 0x2b7   :  { %2177 = vmatprep.subr.bf16.mxu0 %v3391_v55  ;;  %3013 = vmatprep.subr.bf16.mxu1 %v3418_v12 }
 0x2ba   :  { %2178 = vmatpush1.bf16.msra.mxu0 %v3389_v56  ;;  %3014 = vmatpush3.bf16.msra.mxu1 %v3419_v14 }
 0x2bb   :  { %2179 = vmatprep.subr.bf16.mxu0 %v3394_v57  ;;  %3015 = vmatprep.subr.bf16.mxu1 %v3423_v16 }
 0x2be   :  { %2180 = vmatpush1.bf16.msra.mxu0 %v3392_v58  ;;  %3016 = vmatpush3.bf16.msra.mxu1 %v3424_v18 }
 0x2bf   :  { %2181 = vmatprep.subr.bf16.mxu0 %v3397_v59  ;;  %3017 = vmatprep.subr.bf16.mxu1 %v3428_v20 }
 0x2c2   :  { %2182 = vmatpush1.bf16.msra.mxu0 %v3395_v60  ;;  %3018 = vmatpush3.bf16.msra.mxu1 %v3429_v22 }
 0x2c3   :  { %2183 = vmatprep.subr.bf16.mxu0 %v3400_v61  ;;  %3019 = vmatprep.subr.bf16.mxu1 %v3433_v24 }
 0x2c6   :  { %2184 = vmatpush1.bf16.msra.mxu0 %v3398_v62  ;;  %3020 = vmatpush3.bf16.msra.mxu1 %v3434_v26 }
 0x2c7   :  { %2185 = vmatprep.subr.bf16.mxu0 %v3403_v63  ;;  %3021 = vmatprep.subr.bf16.mxu1 %v3438_v28 }
 0x2ca   :  { %2186 = vmatpush1.bf16.msra.mxu0 %v3401_v1  ;;  %3022 = vmatpush3.bf16.msra.mxu1 %v3439_v30 }
 0x2cb   :  { %2187 = vmatprep.subr.bf16.mxu0 %v3406_v2  ;;  %3023 = vmatprep.subr.bf16.mxu1 %v3443_v32 }
 0x2ce   :  { %2188 = vmatpush1.bf16.msra.mxu0 %v3404_v3  ;;  %3024 = vmatpush3.bf16.msra.mxu1 %v3444_v34 }
 0x2cf   :  { %2189 = vmatprep.subr.bf16.mxu0 %v3409_v4  ;;  %3025 = vmatprep.subr.bf16.mxu1 %v3448_v36 }
 0x2d2   :  { %2190 = vmatpush1.bf16.msra.mxu0 %v3407_v5  ;;  %3026 = vmatpush3.bf16.msra.mxu1 %v3449_v38 }
 0x2d3   :  { %2191 = vmatprep.subr.bf16.mxu0 %v3412_v6  ;;  %3121 = vmatprep.subr.bf16.mxu1 %v3680_v10 }
 0x2d6   :  { %2192 = vmatpush1.bf16.msra.mxu0 %v3410_v8 }
 0x2d7   :  { %2193 = vmatprep.subr.bf16.mxu0 %v3417_v11 }
 0x2da   :  { %2194 = vmatpush1.bf16.msra.mxu0 %v3415_v13 }
 0x2db   :  { %2195 = vmatprep.subr.bf16.mxu0 %v3422_v15 }
 0x2de   :  { %2196 = vmatpush1.bf16.msra.mxu0 %v3420_v17 }
 0x2df   :  { %2197 = vmatprep.subr.bf16.mxu0 %v3427_v19 }
 0x2e2   :  { %2198 = vmatpush1.bf16.msra.mxu0 %v3425_v21 }
 0x2e3   :  { %2199 = vmatprep.subr.bf16.mxu0 %v3432_v23 }
 0x2e6   :  { %2200 = vmatpush1.bf16.msra.mxu0 %v3430_v25 }
 0x2e7   :  { %2201 = vmatprep.subr.bf16.mxu0 %v3437_v27 }
 0x2ea   :  { %2202 = vmatpush1.bf16.msra.mxu0 %v3435_v29 }
 0x2eb   :  { %2203 = vmatprep.subr.bf16.mxu0 %v3442_v31 }
 0x2ee   :  { %2204 = vmatpush1.bf16.msra.mxu0 %v3440_v33 }
 0x2ef   :  { %2205 = vmatprep.subr.bf16.mxu0 %v3447_v35 }
 0x2f2   :  { %2206 = vmatpush1.bf16.msra.mxu0 %v3445_v37 }
 0x2f3   :  { %2216 = vmatprep.subr.bf16.mxu0 %v3452_v39 }
 0x368   :  { %v2996_v40 = vpop.f32.mrb[4].mxu0 }
 0x369   :  { %v2997_v41 = vpop.f32.mrb[5].mxu0 }
 0x36a   :  { %v2998_v42 = vadd.f32 %v2997_v41, %v2996_v40  ;;  %v2999_v43 = vpop.f32.mrb[6].mxu0 }
 0x36b   :  { %v3000_v44 = vpop.f32.mrb[7].mxu0 }
 0x388   :  { %v1545_v45 = vpop.f32.mrb[16].mxu1  ;;  %v1626_v46 = vpop.f32.mrb[8].mxu0 }
 0x389   :  { %v1632_v47 = vrot.slane %v1545_v45, 4  ;;  %v1627_v48 = vadd.f32 %v2998_v42, %v1626_v46  ;;  %v1547_v49 = vpop.f32.mrb[17].mxu1  ;;  %v3119_v50 = vpop.f32.mrb[9].mxu0 }
 0x38a   :  { %v1638_v51 = vrot.slane %v1547_v49, 4  ;;  %v1549_v52 = vpop.f32.mrb[18].mxu1  ;;  %v1629_v53 = vpop.f32.mrb[10].mxu0 }
 0x38b   :  { %v1633_v54 = vadd.f32 %v1632_v47, %v1545_v45  ;;  %v1644_v55 = vrot.slane %v1627_v48, 4  ;;  %v1550_v56 = vpop.f32.mrb[19].mxu1  ;;  %v3120_v57 = vpop.f32.mrb[11].mxu0  ;;  %v3454_v53 = vld [vmem:[#allocation8 + $0x198] ss:$12 sps:$4 sm:$0xff]  }
 0x38c   :  { %v1639_v58 = vadd.f32 %v1638_v51, %v1547_v49  ;;  %v3456_v51 = vld [vmem:[#allocation8 + $0x19c] ss:$12 sps:$4 sm:$0xff]  }
 0x38d   :  { %v1634_v59 = vrot.slane %v1633_v54, 2  ;;  %v1645_v60 = vadd.f32 %v1644_v55, %v1627_v48  ;;  %v3460_v55 = vld [vmem:[#allocation8 + $0x1b4] ss:$12 sps:$4 sm:$0xff]   ;;  %v3458_v57 = vld [vmem:[#allocation8 + $0x1b0] ss:$12 sps:$4 sm:$0xff]  }
 0x38e   :  { %v1640_v61 = vrot.slane %v1639_v58, 2 }
 0x38f   :  { %v1635_v62 = vadd.f32 %v1634_v59, %v1633_v54  ;;  %v1646_v63 = vrot.slane %v1645_v60, 2  ;;  %v3457_v54 = vld [vmem:[#allocation8 + $0x1a0] ss:$12 sps:$4 sm:$0xff]  }
 0x390   :  { %v1641_v1 = vadd.f32 %v1640_v61, %v1639_v58  ;;  %v3461_v58 = vld [vmem:[#allocation8 + $0x1b8] ss:$12 sps:$4 sm:$0xff]   ;;  %v3465_v61 = vld [vmem:[#allocation8 + $0x1d0] ss:$12 sps:$4 sm:$0xff]  }
 0x391   :  { %v1636_v2 = vrot.slane %v1635_v62, 1  ;;  %v1647_v3 = vadd.f32 %v1646_v63, %v1645_v60  ;;  %v3464_v59 = vld [vmem:[#allocation8 + $0x1cc] ss:$12 sps:$4 sm:$0xff]   ;;  %v3462_v60 = vld [vmem:[#allocation8 + $0x1c8] ss:$12 sps:$4 sm:$0xff]  }
 0x392   :  { %v1642_v4 = vrot.slane %v1641_v1, 1  ;;  %v3469_v63 = vld [vmem:[#allocation8 + $0x1e8] ss:$12 sps:$4 sm:$0xff]  }
 0x393   :  { %v1637_v5 = vadd.f32 %v1636_v2, %v1635_v62  ;;  %v1648_v6 = vrot.slane %v1647_v3, 1  ;;  %v3466_v62 = vld [vmem:[#allocation8 + $0x1e0] ss:$12 sps:$4 sm:$0xff]   ;;  %v3470_v2 = vld [vmem:[#allocation8 + $0x1f8] ss:$12 sps:$4 sm:$0xff]  }
 0x394   :  { %v1643_v7 = vadd.f32 %v1642_v4, %v1641_v1  ;;  %v3472_v1 = vld [vmem:[#allocation8 + $0x1fc] ss:$12 sps:$4 sm:$0xff]   ;;  %v3476_v4 = vld [vmem:[#allocation8 + $0x214] ss:$12 sps:$4 sm:$0xff]  }
 0x395   :  { %v1650_v8 = vmul.f32 0.125, %v1637_v5  ;;  %v1649_v12 = vadd.f32 %v1648_v6, %v1647_v3  ;;  %v3473_v3 = vld [vmem:[#allocation8 + $0x200] ss:$12 sps:$4 sm:$0xff]   ;;  %v3474_v6 = vld [vmem:[#allocation8 + $0x210] ss:$12 sps:$4 sm:$0xff]  }
 0x396   :  { %v1651_v9 = vmul.f32 0.125, %v1643_v7  ;;  %v3477_v7 = vld [vmem:[#allocation8 + $0x218] ss:$12 sps:$4 sm:$0xff]  }
 0x397   :  { %v1653_v11 = vsub.f32 %v1545_v45, %v1650_v8  ;;  %v1652_v17 = vmul.f32 0.125, %v1649_v12  ;;  %v3481_v12 = vld [vmem:[#allocation8 + $0x230] ss:$12 sps:$4 sm:$0xff]  }
 0x398   :  { %v1654_v13 = vsub.f32 %v1547_v49, %v1651_v9  ;;  %v3453_v49 = vld [vmem:[#allocation8 + $0x188] ss:$12 sps:$4 sm:$0xff]   ;;  %v3480_v9 = vld [vmem:[#allocation8 + $0x22c] ss:$12 sps:$4 sm:$0xff]  }
 0x399   :  { %v1656_v14 = vmul.f32 %v1653_v11, %v1653_v11  ;;  %v3852_v22 = vsub.f32 %v1627_v48, %v1652_v17  ;;  %v3450_v48 = vld [vmem:[#allocation8 + $0x180] ss:$12 sps:$4 sm:$0xff]  }
 0x39a   :  { %v1657_v15 = vmul.f32 %v1654_v13, %v1654_v13  ;;  %v3484_v17 = vld [vmem:[#allocation10 + $0x80] sm:$0xff]  }
 0x39b   :  { %v1659_v16 = vrot.slane %v1656_v14, 4  ;;  %v1658_v27 = vmul.f32 %v3852_v22, %v3852_v22 }
 0x39c   :  { %v1665_v18 = vrot.slane %v1657_v15, 4 }
 0x39d   :  { %v1660_v19 = vadd.f32 %v1659_v16, %v1656_v14  ;;  %v1671_v32 = vrot.slane %v1658_v27, 4  ;;  %v3483_v16 = vld [vmem:[#allocation10] sm:$0xff]  }
 0x39e   :  { %v1666_v20 = vadd.f32 %v1665_v18, %v1657_v15  ;;  %v3482_v15 = vld [vmem:[#allocation10 + $0x40] sm:$0xff]   ;;  %v3485_v18 = vld [vmem:[#allocation10 + $0x48] sm:$0xff]  }
 0x39f   :  { %v1661_v21 = vrot.slane %v1660_v19, 2  ;;  %v1672_v36 = vadd.f32 %v1671_v32, %v1658_v27  ;;  %v3494_v27 = vld [vmem:[#allocation10 + $0x60] sm:$0xff]   ;;  %v3499_v32 = vld [vmem:[#allocation10 + $0xa8] sm:$0xff]  }
 0x3a0   :  { %v1667_v23 = vrot.slane %v1666_v20, 2 }
 0x3a1   :  { %v1662_v24 = vadd.f32 %v1661_v21, %v1660_v19  ;;  %v1673_v37 = vrot.slane %v1672_v36, 2  ;;  %v3486_v19 = vld [vmem:[#allocation10 + $0x8] sm:$0xff]   ;;  %v3488_v21 = vld [vmem:[#allocation10 + $0x50] sm:$0xff]  }
 0x3a2   :  { %v1668_v25 = vadd.f32 %v1667_v23, %v1666_v20  ;;  %v3487_v20 = vld [vmem:[#allocation10 + $0x88] sm:$0xff]   ;;  %v3490_v23 = vld [vmem:[#allocation10 + $0x90] sm:$0xff]  }
 0x3a3   :  { %v1663_v26 = vrot.slane %v1662_v24, 1  ;;  %v1674_v38 = vadd.f32 %v1673_v37, %v1672_v36  ;;  %v3503_v36 = vld [vmem:[#allocation10 + $0x78] sm:$0xff]  }
 0x3a4   :  { %v1669_v28 = vrot.slane %v1668_v25, 1  ;;  %v3504_v37 = vld [vmem:[#allocation10 + $0x38] sm:$0xff]  }
 0x3a5   :  { %v1664_v29 = vadd.f32 %v1663_v26, %v1662_v24  ;;  %v1675_v42 = vrot.slane %v1674_v38, 1  ;;  %v3491_v24 = vld [vmem:[#allocation10 + $0x58] sm:$0xff]  }
 0x3a6   :  { %v1670_v30 = vadd.f32 %v1669_v28, %v1668_v25  ;;  %v3492_v25 = vld [vmem:[#allocation10 + $0x18] sm:$0xff]   ;;  %v3495_v28 = vld [vmem:[#allocation10 + $0x20] sm:$0xff]  }
 0x3a7   :  { %v1677_v31 = vmul.f32 0.125, %v1664_v29  ;;  %v1676_v46 = vadd.f32 %v1675_v42, %v1674_v38  ;;  %v3493_v26 = vld [vmem:[#allocation10 + $0x98] sm:$0xff]   ;;  %v3496_v29 = vld [vmem:[#allocation10 + $0xa0] sm:$0xff]  }
 0x3a8   :  { %v1678_v33 = vmul.f32 0.125, %v1670_v30  ;;  %v3497_v30 = vld [vmem:[#allocation10 + $0x68] sm:$0xff]   ;;  %v3505_v38 = vld [vmem:[#allocation10 + $0xb8] sm:$0xff]  }
 0x3a9   :  { %v1680_v34 = vadd.f32 1e-05, %v1677_v31  ;;  %v1679_v52 = vmul.f32 0.125, %v1676_v46  ;;  %v3498_v31 = vld [vmem:[#allocation10 + $0x28] sm:$0xff]  }
 0x3aa   :  { %v1681_v35 = vadd.f32 1e-05, %v1678_v33  ;;  %v3500_v33 = vld [vmem:[#allocation10 + $0x70] sm:$0xff]  }
 0x3ab   :  { %3518 = vrsqrt.f32 %v1680_v34  ;;  %v1682_v56 = vadd.f32 1e-05, %v1679_v52  ;;  %v3501_v34 = vld [vmem:[#allocation10 + $0x30] sm:$0xff]  }
 0x3ac   :  { %3520 = vrsqrt.f32 %v1681_v35  ;;  %v3502_v35 = vld [vmem:[#allocation10 + $0xb0] sm:$0xff]  }
 0x3ad   :  { %3522 = vrsqrt.f32 %v1682_v56 }
 0x3b5   :  { %v3519_v39 = vpop.eup %3518 }
 0x3b6   :  { %v3521_v40 = vpop.eup %3520  ;;  %v1686_v41 = vmul.f32 %v3519_v39, %v1653_v11  ;;  %v3478_v11 = vld [vmem:[#allocation8 + $0x228] ss:$12 sps:$4 sm:$0xff]  }
 0x3b7   :  { %v1687_v43 = vmul.f32 %v3521_v40, %v1654_v13  ;;  %v3523_v5 = vpop.eup %3522 }
 0x3b8   :  { %v1689_v44 = vmax.f32 %v1686_v41, 0.0  ;;  %v1688_v8 = vmul.f32 %v3523_v5, %v3852_v22  ;;  %v3489_v22 = vld [vmem:[#allocation10 + $0x10] sm:$0xff]  }
 0x3b9   :  { %v1690_v45 = vmax.f32 %v1687_v43, 0.0 }
 0x3ba   :  { %v1692_v50 = vpack.c.bf16 %v1689_v44, %v1689_v44  ;;  %v1691_v13 = vmax.f32 %v1688_v8, 0.0 }
 0x3bb   :  { %v1693_v47 = vpack.c.bf16 %v1690_v45, %v1690_v45 }
 0x3bc   :  { %v1694_v14 = vpack.c.bf16 %v1691_v13, %v1691_v13 }
 0x3bd   :  { %2207 = vmatprep.mubr.bf16.mxu0 %v1693_v47  ;;  %2289 = vmatprep.mubr.bf16.mxu1 %v1693_v47 }
 0x3be   :  { %2208 = vmatmul.mubr.bf16.vlgmr.msra.gmra.mrb[12].mxu0 %v1692_v50  ;;  %2290 = vmatmul.mubr.bf16.vlgmr.msra.gmra.mrb[20].mxu1 %v1692_v50 }
 0x3bf   :  { %2217 = vmatpush1.bf16.msra.mxu0 %v3450_v48  ;;  %3122 = vmatpush3.bf16.msra.mxu1 %v3453_v49 }
 0x3c0   :  { %2218 = vmatprep.subr.bf16.mxu0 %v3456_v51  ;;  %3123 = vmatprep.subr.bf16.mxu1 %v3680_v10 }
 0x3c1   :  { %2248 = vmatprep.mubr.bf16.mxu0 %v3679_v0  ;;  %3137 = vmatprep.mubr.msk.bf16.mxu1 %vm3681_vm1, %v3680_v10  ;;  %v3468_v0 = vld [vmem:[#allocation8 + $0x1e4] ss:$12 sps:$4 sm:$0xff]  }
 0x3c3   :  { %2219 = vmatpush1.bf16.msra.mxu0 %v3454_v53  ;;  %3124 = vmatpush3.bf16.msra.mxu1 %v3457_v54 }
 0x3c4   :  { %2220 = vmatprep.subr.bf16.mxu0 %v3460_v55  ;;  %3125 = vmatprep.subr.bf16.mxu1 %v3680_v10 }
 0x3c7   :  { %2221 = vmatpush1.bf16.msra.mxu0 %v3458_v57  ;;  %3126 = vmatpush3.bf16.msra.mxu1 %v3461_v58 }
 0x3c8   :  { %2222 = vmatprep.subr.bf16.mxu0 %v3464_v59  ;;  %3127 = vmatprep.subr.bf16.mxu1 %v3680_v10 }
 0x3cb   :  { %2223 = vmatpush1.bf16.msra.mxu0 %v3462_v60  ;;  %3128 = vmatpush3.bf16.msra.mxu1 %v3465_v61 }
 0x3cc   :  { %2224 = vmatprep.subr.bf16.mxu0 %v3468_v0  ;;  %3129 = vmatprep.subr.bf16.mxu1 %v3680_v10 }
 0x3cf   :  { %2225 = vmatpush1.bf16.msra.mxu0 %v3466_v62  ;;  %3130 = vmatpush3.bf16.msra.mxu1 %v3469_v63 }
 0x3d0   :  { %2226 = vmatprep.subr.bf16.mxu0 %v3472_v1  ;;  %3131 = vmatprep.subr.bf16.mxu1 %v3680_v10 }
 0x3d3   :  { %2227 = vmatpush1.bf16.msra.mxu0 %v3470_v2  ;;  %3132 = vmatpush3.bf16.msra.mxu1 %v3473_v3 }
 0x3d4   :  { %2228 = vmatprep.subr.bf16.mxu0 %v3476_v4  ;;  %3133 = vmatprep.subr.bf16.mxu1 %v3680_v10 }
 0x3d7   :  { %2229 = vmatpush1.bf16.msra.mxu0 %v3474_v6  ;;  %3134 = vmatpush3.bf16.msra.mxu1 %v3477_v7 }
 0x3d8   :  { %2230 = vmatprep.subr.bf16.mxu0 %v3480_v9  ;;  %3135 = vmatprep.subr.bf16.mxu1 %v3680_v10 }
 0x3db   :  { %2231 = vmatpush1.bf16.msra.mxu0 %v3478_v11  ;;  %3136 = vmatpush3.bf16.msra.mxu1 %v3481_v12 }
 0x3dc   :  { %3141 = vmatprep.subr.bf16.mxu0 %v3680_v10  ;;  %3042 = vmatprep.subr.bf16.mxu1 %v3482_v15 }
 0x3de   :  { %2249 = vmatmul.mubr.bf16.vlgmr.msra.gmra.mrb[12].mxu0 %v1694_v14  ;;  %3138 = vmatmul.mubr.bf16.vlgmr.msra.gmra.mrb[24].mxu1 %v1694_v14 }
 0x3df   :  { %3157 = vmatprep.mubr.msk.bf16.mxu0 %vm3681_vm1, %v3680_v10  ;;  %3043 = vmatpush3.bf16.msra.mxu1 %v3483_v16 }
 0x3e0   :  { %3142 = vmatpush3.bf16.msra.mxu0 %v3484_v17  ;;  %3044 = vmatprep.subr.bf16.mxu1 %v3485_v18 }
 0x3e1   :  { %3143 = vmatprep.subr.bf16.mxu0 %v3680_v10 }
 0x3e3   :  { %3045 = vmatpush3.bf16.msra.mxu1 %v3486_v19 }
 0x3e4   :  { %3144 = vmatpush3.bf16.msra.mxu0 %v3487_v20  ;;  %3046 = vmatprep.subr.bf16.mxu1 %v3488_v21 }
 0x3e5   :  { %3145 = vmatprep.subr.bf16.mxu0 %v3680_v10 }
 0x3e7   :  { %3047 = vmatpush3.bf16.msra.mxu1 %v3489_v22 }
 0x3e8   :  { %3146 = vmatpush3.bf16.msra.mxu0 %v3490_v23  ;;  %3048 = vmatprep.subr.bf16.mxu1 %v3491_v24 }
 0x3e9   :  { %3147 = vmatprep.subr.bf16.mxu0 %v3680_v10 }
 0x3eb   :  { %3049 = vmatpush3.bf16.msra.mxu1 %v3492_v25 }
 0x3ec   :  { %3148 = vmatpush3.bf16.msra.mxu0 %v3493_v26  ;;  %3050 = vmatprep.subr.bf16.mxu1 %v3494_v27 }
 0x3ed   :  { %3149 = vmatprep.subr.bf16.mxu0 %v3680_v10 }
 0x3ef   :  { %3051 = vmatpush3.bf16.msra.mxu1 %v3495_v28 }
 0x3f0   :  { %3150 = vmatpush3.bf16.msra.mxu0 %v3496_v29  ;;  %3052 = vmatprep.subr.bf16.mxu1 %v3497_v30 }
 0x3f1   :  { %3151 = vmatprep.subr.bf16.mxu0 %v3680_v10 }
 0x3f3   :  { %3053 = vmatpush3.bf16.msra.mxu1 %v3498_v31 }
 0x3f4   :  { %3152 = vmatpush3.bf16.msra.mxu0 %v3499_v32  ;;  %3054 = vmatprep.subr.bf16.mxu1 %v3500_v33 }
 0x3f5   :  { %3153 = vmatprep.subr.bf16.mxu0 %v3680_v10 }
 0x3f7   :  { %3055 = vmatpush3.bf16.msra.mxu1 %v3501_v34 }
 0x3f8   :  { %3154 = vmatpush3.bf16.msra.mxu0 %v3502_v35  ;;  %3056 = vmatprep.subr.bf16.mxu1 %v3503_v36 }
 0x3f9   :  { %3155 = vmatprep.subr.bf16.mxu0 %v3680_v10 }
 0x3fb   :  { %3057 = vmatpush3.bf16.msra.mxu1 %v3504_v37 }
 0x3fc   :  { %3156 = vmatpush3.bf16.msra.mxu0 %v3505_v38 }
 0x491   :  { %v3027_v39 = vpop.f32.mrb[20].mxu1 }
 0x492   :  { %v3028_v40 = vpop.f32.mrb[21].mxu1 }
 0x493   :  { %v3029_v41 = vadd.f32 %v3028_v40, %v3027_v39  ;;  %v3030_v42 = vpop.f32.mrb[22].mxu1 }
 0x494   :  { %v3031_v43 = vpop.f32.mrb[23].mxu1 }
 0x4b1   :  { %v2250_v44 = vpop.f32.mrb[12].mxu0  ;;  %v2331_v45 = vpop.f32.mrb[24].mxu1 }
 0x4b2   :  { %v2337_v46 = vrot.slane %v2250_v44, 4  ;;  %v2332_v47 = vadd.f32 %v3029_v41, %v2331_v45  ;;  %v2252_v48 = vpop.f32.mrb[13].mxu0  ;;  %v3139_v49 = vpop.f32.mrb[25].mxu1 }
 0x4b3   :  { %v2343_v50 = vrot.slane %v2252_v48, 4  ;;  %v2254_v51 = vpop.f32.mrb[14].mxu0  ;;  %v2334_v52 = vpop.f32.mrb[26].mxu1 }
 0x4b4   :  { %v2338_v10 = vadd.f32 %v2337_v46, %v2250_v44  ;;  %v2349_v53 = vrot.slane %v2332_v47, 4  ;;  %v2255_v54 = vpop.f32.mrb[15].mxu0  ;;  %v3140_v55 = vpop.f32.mrb[27].mxu1 }
 0x4b5   :  { %v2344_v56 = vadd.f32 %v2343_v50, %v2252_v48 }
 0x4b6   :  { %v2339_v57 = vrot.slane %v2338_v10, 2  ;;  %v2350_v58 = vadd.f32 %v2349_v53, %v2332_v47  ;;  %v2921_v53 = vld [vmem:[%s3898_s6] ss:$0 sm:$0xff] }
 0x4b7   :  { %v2345_v59 = vrot.slane %v2344_v56, 2 }
 0x4b8   :  { %v2340_v60 = vadd.f32 %v2339_v57, %v2338_v10  ;;  %v2351_v61 = vrot.slane %v2350_v58, 2 }
 0x4b9   :  { %v2346_v0 = vadd.f32 %v2345_v59, %v2344_v56 }
 0x4ba   :  { %v2341_v62 = vrot.slane %v2340_v60, 1  ;;  %v2352_v63 = vadd.f32 %v2351_v61, %v2350_v58 }
 0x4bb   :  { %v2347_v1 = vrot.slane %v2346_v0, 1 }
 0x4bc   :  { %v2342_v2 = vadd.f32 %v2341_v62, %v2340_v60  ;;  %v2353_v3 = vrot.slane %v2352_v63, 1 }
 0x4bd   :  { %v2348_v4 = vadd.f32 %v2347_v1, %v2346_v0 }
 0x4be   :  { %v2355_v5 = vmul.f32 0.125, %v2342_v2  ;;  %v2354_v6 = vadd.f32 %v2353_v3, %v2352_v63 }
 0x4bf   :  { %v2356_v7 = vmul.f32 0.125, %v2348_v4 }
 0x4c0   :  { %v2358_v8 = vsub.f32 %v2250_v44, %v2355_v5  ;;  %v2357_v9 = vmul.f32 0.125, %v2354_v6 }
 0x4c1   :  { %v2359_v11 = vsub.f32 %v2252_v48, %v2356_v7 }
 0x4c2   :  { %v2361_v12 = vmul.f32 %v2358_v8, %v2358_v8  ;;  %v2360_v13 = vsub.f32 %v2332_v47, %v2357_v9 }
 0x4c3   :  { %v2362_v14 = vmul.f32 %v2359_v11, %v2359_v11 }
 0x4c4   :  { %v2364_v15 = vrot.slane %v2361_v12, 4  ;;  %v2363_v16 = vmul.f32 %v2360_v13, %v2360_v13 }
 0x4c5   :  { %v2370_v17 = vrot.slane %v2362_v14, 4 }
 0x4c6   :  { %v2365_v18 = vadd.f32 %v2364_v15, %v2361_v12  ;;  %v2376_v19 = vrot.slane %v2363_v16, 4 }
 0x4c7   :  { %v2371_v20 = vadd.f32 %v2370_v17, %v2362_v14 }
 0x4c8   :  { %v2366_v21 = vrot.slane %v2365_v18, 2  ;;  %v2377_v22 = vadd.f32 %v2376_v19, %v2363_v16 }
 0x4c9   :  { %v2372_v23 = vrot.slane %v2371_v20, 2 }
 0x4ca   :  { %v2367_v24 = vadd.f32 %v2366_v21, %v2365_v18  ;;  %v2378_v25 = vrot.slane %v2377_v22, 2 }
 0x4cb   :  { %v2373_v26 = vadd.f32 %v2372_v23, %v2371_v20 }
 0x4cc   :  { %v2368_v27 = vrot.slane %v2367_v24, 1  ;;  %v2379_v28 = vadd.f32 %v2378_v25, %v2377_v22 }
 0x4cd   :  { %v2374_v29 = vrot.slane %v2373_v26, 1 }
 0x4ce   :  { %v2369_v30 = vadd.f32 %v2368_v27, %v2367_v24  ;;  %v2380_v31 = vrot.slane %v2379_v28, 1 }
 0x4cf   :  { %v2375_v32 = vadd.f32 %v2374_v29, %v2373_v26 }
 0x4d0   :  { %v2382_v33 = vmul.f32 0.125, %v2369_v30  ;;  %v2381_v34 = vadd.f32 %v2380_v31, %v2379_v28 }
 0x4d1   :  { %v2383_v35 = vmul.f32 0.125, %v2375_v32 }
 0x4d2   :  { %v2385_v36 = vadd.f32 1e-05, %v2382_v33  ;;  %v2384_v37 = vmul.f32 0.125, %v2381_v34 }
 0x4d3   :  { %v2386_v38 = vadd.f32 1e-05, %v2383_v35 }
 0x4d4   :  { %3524 = vrsqrt.f32 %v2385_v36  ;;  %v2387_v39 = vadd.f32 1e-05, %v2384_v37 }
 0x4d5   :  { %3526 = vrsqrt.f32 %v2386_v38 }
 0x4d6   :  { %3528 = vrsqrt.f32 %v2387_v39 }
 0x4de   :  { %v3525_v40 = vpop.eup %3524 }
 0x4df   :  { %v3527_v41 = vpop.eup %3526  ;;  %v2391_v42 = vmul.f32 %v3525_v40, %v2358_v8 }
 0x4e0   :  { %v3529_v43 = vpop.eup %3528  ;;  %v2392_v44 = vmul.f32 %v3527_v41, %v2359_v11 }
 0x4e1   :  { %v2394_v45 = vmax.f32 %v2391_v42, 0.0  ;;  %v2393_v46 = vmul.f32 %v3529_v43, %v2360_v13 }
 0x4e2   :  { %v2395_v47 = vmax.f32 %v2392_v44, 0.0 }
 0x4e3   :  { %v2396_v48 = vmax.f32 %v2393_v46, 0.0  ;;  %v2397_v50 = vpack.c.bf16 %v2394_v45, %v2394_v45 }
 0x4e4   :  { %v2398_v49 = vpack.c.bf16 %v2395_v47, %v2395_v47 }
 0x4e5   :  { %v2399_v51 = vpack.c.bf16 %v2396_v48, %v2396_v48 }
 0x4e6   :  { %2631 = vmatprep.mubr.bf16.mxu1 %v2398_v49 }
 0x4e7   :  { %2632 = vmatmul.mubr.bf16.vlgmr.msra.gmra.mrb[28].mxu1 %v2397_v50  ;;  %3158 = vmatmul.mubr.bf16.vlgmr.msra.gmra.mrb[16].mxu0 %v2399_v51 }
 0x5ba   :  { %v3058_v52 = vpop.f32.mrb[28].mxu1  ;;  %v2673_v10 = vpop.f32.mrb[16].mxu0 }
 0x5bb   :  { %v3059_v54 = vpop.f32.mrb[29].mxu1  ;;  %v3159_v55 = vpop.f32.mrb[17].mxu0 }
 0x5bc   :  { %v3060_v56 = vadd.f32 %v3059_v54, %v3058_v52  ;;  %v3061_v57 = vpop.f32.mrb[30].mxu1  ;;  %v2676_v58 = vpop.f32.mrb[18].mxu0 }
 0x5bd   :  { %v3062_v59 = vpop.f32.mrb[31].mxu1  ;;  %v3160_v60 = vpop.f32.mrb[19].mxu0 }
 0x5be   :  { %v2634_v61 = vadd.f32 %v3060_v56, %v2921_v53 }
 0x5c0   :  { %v2674_v0 = vadd.f32 %v2673_v10, %v2634_v61 }
 0x5c2   :  { %2679 = vst [vmem:[#allocation11] sm:$0xff] %v2674_v0 }
 0x5c3   :  { %3651 = shalt.err (!%p3648_p2)
}
 0x5c4   :  { %s3652_s21 = scalar_lea.hbm %s3899_s7, 128 }
 0x5c5   :  { %p3653_p3 = scmp.ne.s32.totalorder %s3899_s7, %s3652_s21  ;;  %p3656_p4 = scmp.lt.u32.totalorder %s3652_s21, %s3899_s7 }
 0x5c7   :  { %p3658_p5 = pnand %p3656_p4, %p3653_p3 }
 0x5c9   :  { %3661 = shalt.err (!%p3658_p5)
}
 0x5ca   :  { %2689 = dma.vmem_to_hbm [thread:$0]  %s2687_s18, 128, %s3899_s7, [#allocation4]  }
 0x5cb   :  { %3668 = dma.done.wait [#allocation4], 128  }
 0x5cc   :  { %3669 = vsyncadd [#allocation4], 4294967168 }
 0x5cd   :  { %2693 = vsyncpa [#allocation3], 1 }
 0x5ce   :  { %2694 = vsyncpa [#allocation6], 1 }
 0x5cf   :  { %2695 = vsyncpa [#allocation9], 1 }
 0x5d0   :  { %2696 = vsyncpa [#allocation4], 1 }

</bundles_post_ra>
